<compile_context>
chip_gen: v7x
topology: tpu7x:2x2x1
jax: 0.10.0
libtpu: 0.0.40
codegen_flags: <defaults>
</compile_context>

<pallas_src>
import functools

import jax
import jax.numpy as jnp
from jax.experimental import pallas as pl
from jax.experimental.pallas import tpu as pltpu


def reglog_kernel(p_ref, wt_ref, b_ref, o_ref):
    k = pl.program_id(0)

    @pl.when(k == 0)
    def _():
        o_ref[...] = jnp.zeros_like(o_ref)

    # bf16 x bf16 matmul on the MXU, f32 accumulation directly into the resident
    # output block (its block index is constant across the K axis).
    lhs = p_ref[...].astype(jnp.bfloat16)
    o_ref[...] += jnp.dot(lhs, wt_ref[...], preferred_element_type=jnp.float32)

    @pl.when(k == pl.num_programs(0) - 1)
    def _():
        y = o_ref[...] + b_ref[...]                         # (B, L) f32
        # F.normalize(p=2, dim=1, eps=1e-12): y / max(||y||, eps)
        ss = jnp.sum(y * y, axis=-1, keepdims=True)
        inv = jax.lax.rsqrt(jnp.maximum(ss, jnp.float32(1e-12) ** 2))
        o_ref[...] = (y * inv).astype(o_ref.dtype)


def prepare_reglog_params(weight, bias):
    """One-time parameter prep (hoisted out of the per-forward hot path).

    weight: (L, S) f32 nn.Linear weight  ->  (S, L) bf16 transposed weight
    bias:   (L,)   f32                   ->  (1, L) f32 row
    """
    wt_bf16 = jnp.asarray(weight).T.astype(jnp.bfloat16)
    bias_row = jnp.asarray(bias).astype(jnp.float32).reshape(1, -1)
    return wt_bf16, bias_row


@functools.partial(jax.jit, static_argnames=("kernel", "stride", "padding", "tk"))
def reglog_forward(x, wt_bf16, bias_row, *, kernel=4, stride=4, padding=1, tk=None):
    """x: (B, C, H, W) NCHW f32, wt_bf16: (S, L) bf16, bias_row: (1, L) f32."""
    B, C, H, W = x.shape
    S, L = wt_bf16.shape

    # --- AvgPool2d(kernel, stride, padding, count_include_pad=True) in the wrapper.
    # kernel == stride for every RegLog configuration -> non-overlapping windows.
    xp = jnp.pad(x, ((0, 0), (0, 0), (padding, padding), (padding, padding)))
    Hp, Wp = H + 2 * padding, W + 2 * padding
    oh, ow = (Hp - kernel) // stride + 1, (Wp - kernel) // stride + 1
    assert kernel == stride and Hp == oh * stride and Wp == ow * stride
    assert C * oh * ow == S

    pooled = xp.reshape(B, C, oh, kernel, ow, kernel).mean(axis=(3, 5))  # (B,C,oh,ow)
    pooled = pooled.reshape(B, S)      # PyTorch flatten order; stays f32 (cast in-kernel)

    # K-tiling of the reduction: default is a single grid step (tk == S).
    if tk is None:
        tk = S
    assert S % tk == 0
    nk = S // tk

    cost = pl.CostEstimate(
        flops=2 * B * S * L,
        transcendentals=0,
        bytes_accessed=S * L * 2 + B * S * 4 + B * L * 4 + L * 4,
    )

    return pl.pallas_call(
        reglog_kernel,
        out_shape=jax.ShapeDtypeStruct((B, L), jnp.float32),
        grid=(nk,),
        in_specs=[
            pl.BlockSpec((B, tk), lambda k: (0, k)),   # pooled activations (f32)
            pl.BlockSpec((tk, L), lambda k: (k, 0)),   # pre-transposed bf16 weight
            pl.BlockSpec((1, L), lambda k: (0, 0)),    # bias row (f32)
        ],
        out_specs=pl.BlockSpec((B, L), lambda k: (0, 0)),
        compiler_params=pltpu.CompilerParams(
            dimension_semantics=("arbitrary",),
            vmem_limit_bytes=32 << 20,
        ),
        cost_estimate=cost,
    )(pooled, wt_bf16, bias_row)


def reglog_reference(x, weight, bias, *, kernel=4, stride=4, padding=1):
    """Plain-JAX f32 reference matching the PyTorch forward."""
    xp = jnp.pad(x, ((0, 0), (0, 0), (padding, padding), (padding, padding)))
    B, C, Hp, Wp = xp.shape
    pooled = xp.reshape(B, C, Hp // stride, kernel, Wp // stride, kernel).mean(axis=(3, 5))
    feat = pooled.reshape(B, -1)
    y = feat @ weight.T + bias
    n = jnp.maximum(jnp.linalg.norm(y, axis=1, keepdims=True), 1e-12)
    return y / n


if __name__ == "__main__":
    # layer_num = 5 configuration: AvgPool2d(4, stride=4, padding=1), s = 8192.
    # Input (B=2, C=512, H=W=14) -> padded 16x16 -> pooled 4x4 -> 512*4*4 = 8192 features.
    B, C, H, W = 2, 512, 14, 14
    S = 512 * 4 * 4            # = 8192, matches nn.Linear(s=8192, num_labels)
    L = 128                    # num_labels

    key = jax.random.PRNGKey(0)
    kx, kw, kb = jax.random.split(key, 3)
    x = jax.random.normal(kx, (B, C, H, W), dtype=jnp.float32)
    bound = 1.0 / (S ** 0.5)   # nn.Linear default init range
    weight = jax.random.uniform(kw, (L, S), jnp.float32, -bound, bound)
    bias = jax.random.uniform(kb, (L,), jnp.float32, -bound, bound)

    # One-time parameter prep (outside the per-forward hot path).
    wt_bf16, bias_row = prepare_reglog_params(weight, bias)

    out = reglog_forward(x, wt_bf16, bias_row)
    out = jax.block_until_ready(out)

    ref = reglog_reference(x, weight, bias)
    assert out.shape == (B, L)
    # bf16 matmul weight -> loosened tolerance vs the f32 reference.
    assert jnp.allclose(out, ref, rtol=1e-2, atol=1e-2), "mismatch vs reference"
    # Output is L2-normalized: row norms should be ~1.
    assert jnp.allclose(jnp.linalg.norm(out, axis=1), 1.0, atol=1e-3)

    print("KERNEL_OK")
</pallas_src>

<mosaic_0001>
module attributes {stable_mosaic.version = 11 : i64} {
  func.func @reglog_kernel(%arg0: i32, %arg1: memref<2x8192xf32, #tpu.memory_space<vmem>>, %arg2: memref<8192x128xbf16, #tpu.memory_space<vmem>>, %arg3: memref<1x128xf32, #tpu.memory_space<vmem>>, %arg4: memref<2x128xf32, #tpu.memory_space<vmem>>) attributes {dimension_semantics = [#tpu.dimension_semantics<arbitrary>], iteration_bounds = array<i64: 1>, scalar_prefetch = 0 : i64, scratch_operands = 0 : i64, tpu.core_type = #tpu.core_type<tc>, window_params = [{transform_indices = @transform_0, window_bounds = array<i64: 2, 8192>}, {transform_indices = @transform_1, window_bounds = array<i64: 8192, 128>}, {pipeline_mode = #tpu.pipeline_mode<synchronous>, transform_indices = @transform_2, window_bounds = array<i64: 1, 128>}, {pipeline_mode = #tpu.pipeline_mode<synchronous>, transform_indices = @transform_3, window_bounds = array<i64: 2, 128>}]} {
    %c0_i32 = arith.constant 0 : i32
    %0 = arith.cmpi eq, %arg0, %c0_i32 : i32
    %1 = arith.extui %0 : i1 to i32
    %c0_i32_0 = arith.constant 0 : i32
    %2 = arith.cmpi ne, %1, %c0_i32_0 : i32
    scf.if %2 {
      %cst_10 = arith.constant 0.000000e+00 : f32
      %13 = vector.broadcast %cst_10 : f32 to vector<2x128xf32>
      %c0_11 = arith.constant 0 : index
      %c0_12 = arith.constant 0 : index
      %14 = vector.load %arg4[%c0_11, %c0_12] : memref<2x128xf32, #tpu.memory_space<vmem>>, vector<2x128xf32>
      tpu.vector_store %arg4[%c0_11, %c0_12], %13 {strides = array<i32>} : memref<2x128xf32, #tpu.memory_space<vmem>>, vector<2x128xf32>,
    } else {
    }
    %c0 = arith.constant 0 : index
    %c0_1 = arith.constant 0 : index
    %3 = vector.load %arg1[%c0, %c0_1] : memref<2x8192xf32, #tpu.memory_space<vmem>>, vector<2x8192xf32>
    %4 = arith.truncf %3 : vector<2x8192xf32> to vector<2x8192xbf16>
    %c0_2 = arith.constant 0 : index
    %c0_3 = arith.constant 0 : index
    %5 = vector.load %arg4[%c0_2, %c0_3] : memref<2x128xf32, #tpu.memory_space<vmem>>, vector<2x128xf32>
    %c0_4 = arith.constant 0 : index
    %c0_5 = arith.constant 0 : index
    %6 = vector.load %arg2[%c0_4, %c0_5] : memref<8192x128xbf16, #tpu.memory_space<vmem>>, vector<8192x128xbf16>
    %cst = arith.constant dense<0.000000e+00> : vector<2x128xf32>
    %7 = tpu.matmul %4, %6, %cst {dimension_numbers = #tpu.dot_dimension_numbers<[1], [0], [0], [1], [0, 0, 1, 1], [], []>} : vector<2x8192xbf16>, vector<8192x128xbf16>, vector<2x128xf32> -> vector<2x128xf32>
    %8 = arith.addf %5, %7 : vector<2x128xf32>
    %c0_6 = arith.constant 0 : index
    %c0_7 = arith.constant 0 : index
    %9 = vector.load %arg4[%c0_6, %c0_7] : memref<2x128xf32, #tpu.memory_space<vmem>>, vector<2x128xf32>
    tpu.vector_store %arg4[%c0_6, %c0_7], %8 {strides = array<i32>} : memref<2x128xf32, #tpu.memory_space<vmem>>, vector<2x128xf32>,
    %c0_i32_8 = arith.constant 0 : i32
    %10 = arith.cmpi eq, %arg0, %c0_i32_8 : i32
    %11 = arith.extui %10 : i1 to i32
    %c0_i32_9 = arith.constant 0 : i32
    %12 = arith.cmpi ne, %11, %c0_i32_9 : i32
    scf.if %12 {
      %c0_10 = arith.constant 0 : index
      %c0_11 = arith.constant 0 : index
      %13 = vector.load %arg4[%c0_10, %c0_11] : memref<2x128xf32, #tpu.memory_space<vmem>>, vector<2x128xf32>
      %c0_12 = arith.constant 0 : index
      %c0_13 = arith.constant 0 : index
      %14 = vector.load %arg3[%c0_12, %c0_13] : memref<1x128xf32, #tpu.memory_space<vmem>>, vector<1x128xf32>
      %15 = vector.broadcast %14 : vector<1x128xf32> to vector<2x128xf32>
      %16 = arith.addf %13, %15 : vector<2x128xf32>
      %17 = arith.mulf %16, %16 : vector<2x128xf32>
      %cst_14 = arith.constant dense<0.000000e+00> : vector<2xf32>
      %18 = vector.multi_reduction <add>, %17, %cst_14 [1] : vector<2x128xf32> to vector<2xf32>
      %19 = vector.shape_cast %18 : vector<2xf32> to vector<2x1xf32>
      %cst_15 = arith.constant 9.99999996E-13 : f32
      %20 = arith.mulf %cst_15, %cst_15 : f32
      %21 = vector.broadcast %20 : f32 to vector<2x1xf32>
      %22 = arith.maximumf %19, %21 : vector<2x1xf32>
      %23 = math.rsqrt %22 : vector<2x1xf32>
      %24 = vector.broadcast %23 : vector<2x1xf32> to vector<2x128xf32>
      %25 = arith.mulf %16, %24 : vector<2x128xf32>
      %c0_16 = arith.constant 0 : index
      %c0_17 = arith.constant 0 : index
      %26 = vector.load %arg4[%c0_16, %c0_17] : memref<2x128xf32, #tpu.memory_space<vmem>>, vector<2x128xf32>
      tpu.vector_store %arg4[%c0_16, %c0_17], %25 {strides = array<i32>} : memref<2x128xf32, #tpu.memory_space<vmem>>, vector<2x128xf32>,
    } else {
    }
    return
  }
  func.func @transform_0(%arg0: i32) -> (i32, i32) {
    %c0_i32 = arith.constant 0 : i32
    %c0_i32_0 = arith.constant 0 : i32
    return %c0_i32, %arg0 : i32, i32
  }
  func.func @transform_1(%arg0: i32) -> (i32, i32) {
    %c0_i32 = arith.constant 0 : i32
    %c0_i32_0 = arith.constant 0 : i32
    return %arg0, %c0_i32 : i32, i32
  }
  func.func @transform_2(%arg0: i32) -> (i32, i32) {
    %c0_i32 = arith.constant 0 : i32
    %c0_i32_0 = arith.constant 0 : i32
    %c0_i32_1 = arith.constant 0 : i32
    return %c0_i32, %c0_i32_0 : i32, i32
  }
  func.func @transform_3(%arg0: i32) -> (i32, i32) {
    %c0_i32 = arith.constant 0 : i32
    %c0_i32_0 = arith.constant 0 : i32
    %c0_i32_1 = arith.constant 0 : i32
    return %c0_i32, %c0_i32_0 : i32, i32
  }
}

</mosaic_0001>

<bundles_post_ra>
// kernel: reglog_forward.1
= control target key start
LH: loop header
LB: loop body
LE: loop exit
PB: predicated region body
PF: predicated region fallthrough
CT: control target
= control target key end

     0   :  { %v57_v28 = vlaneseq  ;;  %v7641_v36 = vmov 1983009808   ;;  %s9321_s0 = inlined_call_operand.vmem [shape: f32[2,8192], index: 0, kind: input, shape index: {}]   ;;  %s9322_s1 = inlined_call_operand.vmem [shape: bf16[8192,128], index: 1, kind: input, shape index: {}]   ;;  %s9323_s2 = inlined_call_operand.vmem [shape: f32[1,128], index: 2, kind: input, shape index: {}]   ;;  %s9324_s3 = inlined_call_operand.hbm [shape: f32[2,128], index: 3, kind: output, shape index: {}]  }
   0x1   :  { %v7087_v0 = vld [vmem:[%s9322_s1 + $0x40] sm:$0xff]   ;;  %v7091_v4 = vld [vmem:[%s9322_s1 + $0x48] sm:$0xff]   ;;  %v7095_v8 = vld [vmem:[%s9322_s1 + $0x50] sm:$0xff]   ;;  %v55_v37 = vunpack.c.l.s4 %v7641_v36 }
   0x2   :  { %v7088_v1 = vld [vmem:[%s9322_s1 + $0xc0] sm:$0xff]   ;;  %6380 = vmatprep.subr.bf16.mxu0 %v7087_v0  ;;  %v7092_v5 = vld [vmem:[%s9322_s1 + $0xc8] sm:$0xff]   ;;  %v7096_v9 = vld [vmem:[%s9322_s1 + $0xd0] sm:$0xff]   ;;  %v58_v33 = vshrl.u32 %v57_v28, 7 }
   0x3   :  { %v7089_v2 = vld [vmem:[%s9322_s1] sm:$0xff]   ;;  %6402 = vmatprep.subr.bf16.mxu1 %v7088_v1  ;;  %v7093_v6 = vld [vmem:[%s9322_s1 + $0x8] sm:$0xff]   ;;  %v7097_v10 = vld [vmem:[%s9322_s1 + $0x10] sm:$0xff]   ;;  %v56_v39 = vunpack.c.0.s8 %v55_v37 }
   0x4   :  { %v7090_v3 = vld [vmem:[%s9322_s1 + $0x80] sm:$0xff]   ;;  %6381 = vmatpush3.bf16.msra.mxu0 %v7089_v2  ;;  %v7094_v7 = vld [vmem:[%s9322_s1 + $0x88] sm:$0xff]   ;;  %v7098_v11 = vld [vmem:[%s9322_s1 + $0x90] sm:$0xff]  }
   0x5   :  { %6403 = vmatpush3.bf16.msra.mxu1 %v7090_v3  ;;  %6382 = vmatprep.subr.bf16.mxu0 %v7091_v4  ;;  %v7099_v12 = vld [vmem:[%s9322_s1 + $0x58] sm:$0xff]   ;;  %v7103_v16 = vld [vmem:[%s9322_s1 + $0x60] sm:$0xff]   ;;  %v7107_v20 = vld [vmem:[%s9322_s1 + $0x68] sm:$0xff]   ;;  %v7769_v41 = vsub.s32 %v56_v39, %v58_v33 }
   0x6   :  { %6404 = vmatprep.subr.bf16.mxu1 %v7092_v5  ;;  %v7100_v13 = vld [vmem:[%s9322_s1 + $0xd8] sm:$0xff]   ;;  %v7104_v17 = vld [vmem:[%s9322_s1 + $0xe0] sm:$0xff]   ;;  %v7108_v21 = vld [vmem:[%s9322_s1 + $0xe8] sm:$0xff]  }
   0x7   :  { %v7101_v14 = vld [vmem:[%s9322_s1 + $0x18] sm:$0xff]   ;;  %v7105_v18 = vld [vmem:[%s9322_s1 + $0x20] sm:$0xff]   ;;  %v7109_v22 = vld [vmem:[%s9322_s1 + $0x28] sm:$0xff]  }
   0x8   :  { %6383 = vmatpush3.bf16.msra.mxu0 %v7093_v6  ;;  %v7102_v15 = vld [vmem:[%s9322_s1 + $0x98] sm:$0xff]   ;;  %v7106_v19 = vld [vmem:[%s9322_s1 + $0xa0] sm:$0xff]   ;;  %v7110_v23 = vld [vmem:[%s9322_s1 + $0xa8] sm:$0xff]  }
   0x9   :  { %6405 = vmatpush3.bf16.msra.mxu1 %v7094_v7  ;;  %6384 = vmatprep.subr.bf16.mxu0 %v7095_v8  ;;  %v7111_v24 = vld [vmem:[%s9322_s1 + $0x70] sm:$0xff]   ;;  %v7115_v29 = vld [vmem:[%s9322_s1 + $0x78] sm:$0xff]   ;;  %v21_v34 = vld [vmem:[%s9321_s0] sm:$0xff] }
   0xa   :  { %6406 = vmatprep.subr.bf16.mxu1 %v7096_v9  ;;  %v7112_v25 = vld [vmem:[%s9322_s1 + $0xf0] sm:$0xff]   ;;  %v7116_v30 = vld [vmem:[%s9322_s1 + $0xf8] sm:$0xff]   ;;  %v7120_v35 = vld [vmem:[%s9322_s1 + $0x140] sm:$0xff]   ;;  %v53_v40 = vcombine.high %v21_v34, %v21_v34  ;;  %v60_v42 = vrot.slane %v21_v34, %v7769_v41 }
   0xb   :  { %v7113_v26 = vld [vmem:[%s9322_s1 + $0x30] sm:$0xff]   ;;  %v7117_v31 = vld [vmem:[%s9322_s1 + $0x38] sm:$0xff]   ;;  %v7121_v38 = vld [vmem:[%s9322_s1 + $0x1c0] sm:$0xff]  }
   0xc   :  { %6385 = vmatpush3.bf16.msra.mxu0 %v7097_v10  ;;  %v7114_v27 = vld [vmem:[%s9322_s1 + $0xb0] sm:$0xff]   ;;  %v7118_v32 = vld [vmem:[%s9322_s1 + $0xb8] sm:$0xff]   ;;  %v67_v43 = vrot.slane %v53_v40, %v7769_v41  ;;  %v68_v44 = vcombine.high %v60_v42, %v60_v42  ;;  %v7122_v46 = vld [vmem:[%s9322_s1 + $0x100] sm:$0xff]   ;;  %v389_v47 = vpack.c.bf16 %v60_v42, %v60_v42 }
   0xd   :  { %6407 = vmatpush3.bf16.msra.mxu1 %v7098_v11  ;;  %6386 = vmatprep.subr.bf16.mxu0 %v7099_v12  ;;  %v7123_v49 = vld [vmem:[%s9322_s1 + $0x180] sm:$0xff]   ;;  %v7124_v52 = vld [vmem:[%s9322_s1 + $0x148] sm:$0xff]   ;;  %v7128_v56 = vld [vmem:[%s9322_s1 + $0x150] sm:$0xff]  }
   0xe   :  { %6408 = vmatprep.subr.bf16.mxu1 %v7100_v13  ;;  %v69_v45 = vcombine.high %v67_v43, %v67_v43  ;;  %v391_v48 = vpack.c.bf16 %v67_v43, %v67_v43  ;;  %v390_v50 = vpack.c.bf16 %v68_v44, %v68_v44  ;;  %v7125_v53 = vld [vmem:[%s9322_s1 + $0x1c8] sm:$0xff]   ;;  %v7129_v57 = vld [vmem:[%s9322_s1 + $0x1d0] sm:$0xff]   ;;  %v7132_v60 = vld [vmem:[%s9322_s1 + $0x158] sm:$0xff]  }
   0xf   :  { %v7126_v54 = vld [vmem:[%s9322_s1 + $0x108] sm:$0xff]   ;;  %v7130_v58 = vld [vmem:[%s9322_s1 + $0x110] sm:$0xff]   ;;  %v7133_v61 = vld [vmem:[%s9322_s1 + $0x1d8] sm:$0xff]  }
  0x10   :  { %6387 = vmatpush3.bf16.msra.mxu0 %v7101_v14  ;;  %v392_v51 = vpack.c.bf16 %v69_v45, %v69_v45  ;;  %4582 = vmatprep.mubr.bf16.mxu0 %v390_v50  ;;  %v7127_v55 = vld [vmem:[%s9322_s1 + $0x188] sm:$0xff]   ;;  %v7131_v59 = vld [vmem:[%s9322_s1 + $0x190] sm:$0xff]   ;;  %v7134_v62 = vld [vmem:[%s9322_s1 + $0x118] sm:$0xff]  }
  0x11   :  { %6409 = vmatpush3.bf16.msra.mxu1 %v7102_v15  ;;  %6388 = vmatprep.subr.bf16.mxu0 %v7103_v16  ;;  %v7135_v63 = vld [vmem:[%s9322_s1 + $0x198] sm:$0xff]   ;;  %v7136_v0 = vld [vmem:[%s9322_s1 + $0x160] sm:$0xff]   ;;  %v7140_v4 = vld [vmem:[%s9322_s1 + $0x168] sm:$0xff]  }
  0x12   :  { %6410 = vmatprep.subr.bf16.mxu1 %v7104_v17  ;;  %4622 = vmatprep.mubr.bf16.mxu1 %v392_v51  ;;  %v7137_v1 = vld [vmem:[%s9322_s1 + $0x1e0] sm:$0xff]   ;;  %v7141_v5 = vld [vmem:[%s9322_s1 + $0x1e8] sm:$0xff]   ;;  %v7144_v8 = vld [vmem:[%s9322_s1 + $0x170] sm:$0xff]  }
  0x13   :  { %v7138_v2 = vld [vmem:[%s9322_s1 + $0x120] sm:$0xff]   ;;  %v7142_v6 = vld [vmem:[%s9322_s1 + $0x128] sm:$0xff]   ;;  %v7145_v9 = vld [vmem:[%s9322_s1 + $0x1f0] sm:$0xff]  }
  0x14   :  { %6389 = vmatpush3.bf16.msra.mxu0 %v7105_v18  ;;  %v7139_v3 = vld [vmem:[%s9322_s1 + $0x1a0] sm:$0xff]   ;;  %v7143_v7 = vld [vmem:[%s9322_s1 + $0x1a8] sm:$0xff]   ;;  %v7146_v11 = vld [vmem:[%s9322_s1 + $0x130] sm:$0xff]  }
  0x15   :  { %6411 = vmatpush3.bf16.msra.mxu1 %v7106_v19  ;;  %6390 = vmatprep.subr.bf16.mxu0 %v7107_v20  ;;  %v22_v10 = vld [vmem:[%s9321_s0 + $0x8] sm:$0xff]  ;;  %v7147_v14 = vld [vmem:[%s9322_s1 + $0x1b0] sm:$0xff]   ;;  %v7148_v15 = vld [vmem:[%s9322_s1 + $0x178] sm:$0xff]  }
  0x16   :  { %6412 = vmatprep.subr.bf16.mxu1 %v7108_v21  ;;  %v77_v12 = vrot.slane %v22_v10, %v7769_v41  ;;  %v70_v13 = vcombine.high %v22_v10, %v22_v10  ;;  %v7149_v18 = vld [vmem:[%s9322_s1 + $0x1f8] sm:$0xff]   ;;  %v7160_v33 = vld [vmem:[%s9322_s1 + $0x288] sm:$0xff]   ;;  %v7161_v34 = vld [vmem:[%s9322_s1 + $0x250] sm:$0xff]  }
  0x17   :  { %v7150_v19 = vld [vmem:[%s9322_s1 + $0x138] sm:$0xff]   ;;  %v7163_v36 = vld [vmem:[%s9322_s1 + $0x210] sm:$0xff]   ;;  %v7169_v43 = vld [vmem:[%s9322_s1 + $0x260] sm:$0xff]  }
  0x18   :  { %6391 = vmatpush3.bf16.msra.mxu0 %v7109_v22  ;;  %v85_v16 = vcombine.high %v77_v12, %v77_v12  ;;  %v84_v17 = vrot.slane %v70_v13, %v7769_v41  ;;  %v7151_v22 = vld [vmem:[%s9322_s1 + $0x1b8] sm:$0xff]   ;;  %v7164_v37 = vld [vmem:[%s9322_s1 + $0x290] sm:$0xff]   ;;  %v7170_v44 = vld [vmem:[%s9322_s1 + $0x2e0] sm:$0xff]  }
  0x19   :  { %6413 = vmatpush3.bf16.msra.mxu1 %v7110_v23  ;;  %6392 = vmatprep.subr.bf16.mxu0 %v7111_v24  ;;  %v7153_v24 = vld [vmem:[%s9322_s1 + $0x240] sm:$0xff]   ;;  %v7166_v39 = vld [vmem:[%s9322_s1 + $0x2d8] sm:$0xff]   ;;  %v7176_v50 = vld [vmem:[%s9322_s1 + $0x2a8] sm:$0xff]  }
  0x1a   :  { %6414 = vmatprep.subr.bf16.mxu1 %v7112_v25  ;;  %v394_v20 = vpack.c.bf16 %v85_v16, %v85_v16  ;;  %v86_v21 = vcombine.high %v84_v17, %v84_v17  ;;  %v7154_v25 = vld [vmem:[%s9322_s1 + $0x2c0] sm:$0xff]   ;;  %v395_v28 = vpack.c.bf16 %v84_v17, %v84_v17  ;;  %v7167_v40 = vld [vmem:[%s9322_s1 + $0x218] sm:$0xff]   ;;  %v7177_v51 = vld [vmem:[%s9322_s1 + $0x270] sm:$0xff]  }
  0x1b   :  { %v7168_v42 = vld [vmem:[%s9322_s1 + $0x298] sm:$0xff]   ;;  %v7171_v45 = vld [vmem:[%s9322_s1 + $0x220] sm:$0xff]   ;;  %v7191_v10 = vld [vmem:[%s9322_s1 + $0x3c8] sm:$0xff]  }
  0x1c   :  { %6393 = vmatpush3.bf16.msra.mxu0 %v7113_v26  ;;  %v396_v23 = vpack.c.bf16 %v86_v21, %v86_v21  ;;  %v7155_v26 = vld [vmem:[%s9322_s1 + $0x200] sm:$0xff]   ;;  %v7194_v13 = vld [vmem:[%s9322_s1 + $0x350] sm:$0xff]   ;;  %v7198_v17 = vld [vmem:[%s9322_s1 + $0x358] sm:$0xff]  }
  0x1d   :  { %6415 = vmatpush3.bf16.msra.mxu1 %v7114_v27  ;;  %6394 = vmatprep.subr.bf16.mxu0 %v7115_v29  ;;  %v393_v27 = vpack.c.bf16 %v77_v12, %v77_v12  ;;  %v7156_v29 = vld [vmem:[%s9322_s1 + $0x280] sm:$0xff]   ;;  %v7193_v12 = vld [vmem:[%s9322_s1 + $0x388] sm:$0xff]   ;;  %v7197_v16 = vld [vmem:[%s9322_s1 + $0x390] sm:$0xff]  }
  0x1e   :  { %6416 = vmatprep.subr.bf16.mxu1 %v7116_v30  ;;  %v7157_v30 = vld [vmem:[%s9322_s1 + $0x248] sm:$0xff]   ;;  %v7202_v21 = vld [vmem:[%s9322_s1 + $0x360] sm:$0xff]  }
  0x20   :  { %6395 = vmatpush3.bf16.msra.mxu0 %v7117_v31  ;;  %v7158_v31 = vld [vmem:[%s9322_s1 + $0x2c8] sm:$0xff]  }
  0x21   :  { %6417 = vmatpush3.bf16.msra.mxu1 %v7118_v32  ;;  %6424 = vmatprep.subr.bf16.mxu0 %v7120_v35  ;;  %v7159_v32 = vld [vmem:[%s9322_s1 + $0x208] sm:$0xff]   ;;  %v7162_v35 = vld [vmem:[%s9322_s1 + $0x2d0] sm:$0xff]  }
  0x22   :  { %6446 = vmatprep.subr.bf16.mxu1 %v7121_v38  ;;  %v7165_v38 = vld [vmem:[%s9322_s1 + $0x258] sm:$0xff]  }
  0x23   :  { %4583 = vmatmul.mubr.bf16.vlgmr.msra.gmra.mrb[0].mxu0 %v389_v47  ;;  %v7173_v47 = vld [vmem:[%s9322_s1 + $0x268] sm:$0xff]  }
  0x24   :  { %4623 = vmatmul.mubr.bf16.vlgmr.msra.gmra.mrb[0].mxu1 %v391_v48  ;;  %6425 = vmatpush3.bf16.msra.mxu0 %v7122_v46  ;;  %v7172_v46 = vld [vmem:[%s9322_s1 + $0x2a0] sm:$0xff]   ;;  %v7174_v48 = vld [vmem:[%s9322_s1 + $0x2e8] sm:$0xff]  }
  0x25   :  { %6447 = vmatpush3.bf16.msra.mxu1 %v7123_v49  ;;  %6426 = vmatprep.subr.bf16.mxu0 %v7124_v52  ;;  %v7175_v49 = vld [vmem:[%s9322_s1 + $0x228] sm:$0xff]   ;;  %v7178_v52 = vld [vmem:[%s9322_s1 + $0x2f0] sm:$0xff]  }
  0x26   :  { %6448 = vmatprep.subr.bf16.mxu1 %v7125_v53  ;;  %4662 = vmatprep.mubr.bf16.mxu0 %v394_v20  ;;  %v23_v53 = vld [vmem:[%s9321_s0 + $0x10] sm:$0xff]  ;;  %v7201_v20 = vld [vmem:[%s9322_s1 + $0x398] sm:$0xff]  }
  0x27   :  { %4702 = vmatprep.mubr.bf16.mxu1 %v396_v23  ;;  %v7204_v23 = vld [vmem:[%s9322_s1 + $0x320] sm:$0xff]  }
  0x28   :  { %6427 = vmatpush3.bf16.msra.mxu0 %v7126_v54  ;;  %v7179_v54 = vld [vmem:[%s9322_s1 + $0x230] sm:$0xff]  }
  0x29   :  { %6449 = vmatpush3.bf16.msra.mxu1 %v7127_v55  ;;  %6428 = vmatprep.subr.bf16.mxu0 %v7128_v56  ;;  %v94_v55 = vrot.slane %v23_v53, %v7769_v41  ;;  %v87_v56 = vcombine.high %v23_v53, %v23_v53  ;;  %v7224_v53 = vld [vmem:[%s9322_s1 + $0x4c8] sm:$0xff]  }
  0x2a   :  { %6450 = vmatprep.subr.bf16.mxu1 %v7129_v57  ;;  %v7180_v57 = vld [vmem:[%s9322_s1 + $0x2b0] sm:$0xff]  }
  0x2c   :  { %6429 = vmatpush3.bf16.msra.mxu0 %v7130_v58  ;;  %v7181_v58 = vld [vmem:[%s9322_s1 + $0x278] sm:$0xff]  }
  0x2d   :  { %6451 = vmatpush3.bf16.msra.mxu1 %v7131_v59  ;;  %6430 = vmatprep.subr.bf16.mxu0 %v7132_v60  ;;  %v102_v59 = vcombine.high %v94_v55, %v94_v55  ;;  %v101_v60 = vrot.slane %v87_v56, %v7769_v41  ;;  %v7227_v56 = vld [vmem:[%s9322_s1 + $0x450] sm:$0xff]  }
  0x2e   :  { %6452 = vmatprep.subr.bf16.mxu1 %v7133_v61  ;;  %v7182_v61 = vld [vmem:[%s9322_s1 + $0x2f8] sm:$0xff]  }
  0x30   :  { %6431 = vmatpush3.bf16.msra.mxu0 %v7134_v62  ;;  %v7183_v62 = vld [vmem:[%s9322_s1 + $0x238] sm:$0xff]  }
  0x31   :  { %6453 = vmatpush3.bf16.msra.mxu1 %v7135_v63  ;;  %6432 = vmatprep.subr.bf16.mxu0 %v7136_v0  ;;  %v398_v63 = vpack.c.bf16 %v102_v59, %v102_v59  ;;  %v103_v0 = vcombine.high %v101_v60, %v101_v60  ;;  %v7230_v59 = vld [vmem:[%s9322_s1 + $0x490] sm:$0xff]  }
  0x32   :  { %6454 = vmatprep.subr.bf16.mxu1 %v7137_v1  ;;  %v7184_v1 = vld [vmem:[%s9322_s1 + $0x2b8] sm:$0xff]  }
  0x34   :  { %6433 = vmatpush3.bf16.msra.mxu0 %v7138_v2  ;;  %v400_v2 = vpack.c.bf16 %v103_v0, %v103_v0  ;;  %v7235_v0 = vld [vmem:[%s9322_s1 + $0x460] sm:$0xff]  }
  0x35   :  { %6455 = vmatpush3.bf16.msra.mxu1 %v7139_v3  ;;  %6434 = vmatprep.subr.bf16.mxu0 %v7140_v4  ;;  %v7186_v3 = vld [vmem:[%s9322_s1 + $0x340] sm:$0xff]  }
  0x36   :  { %6456 = vmatprep.subr.bf16.mxu1 %v7141_v5  ;;  %v7187_v4 = vld [vmem:[%s9322_s1 + $0x3c0] sm:$0xff]  }
  0x37   :  { %v7188_v5 = vld [vmem:[%s9322_s1 + $0x300] sm:$0xff]  }
  0x38   :  { %6435 = vmatpush3.bf16.msra.mxu0 %v7142_v6  ;;  %v397_v6 = vpack.c.bf16 %v94_v55, %v94_v55  ;;  %v7226_v55 = vld [vmem:[%s9322_s1 + $0x488] sm:$0xff]  }
  0x39   :  { %6457 = vmatpush3.bf16.msra.mxu1 %v7143_v7  ;;  %6436 = vmatprep.subr.bf16.mxu0 %v7144_v8  ;;  %v399_v7 = vpack.c.bf16 %v101_v60, %v101_v60  ;;  %v7189_v8 = vld [vmem:[%s9322_s1 + $0x380] sm:$0xff]   ;;  %v7231_v60 = vld [vmem:[%s9322_s1 + $0x458] sm:$0xff]  }
  0x3a   :  { %6458 = vmatprep.subr.bf16.mxu1 %v7145_v9  ;;  %v7190_v9 = vld [vmem:[%s9322_s1 + $0x348] sm:$0xff]  }
  0x3c   :  { %6437 = vmatpush3.bf16.msra.mxu0 %v7146_v11  ;;  %v7192_v11 = vld [vmem:[%s9322_s1 + $0x308] sm:$0xff]  }
  0x3d   :  { %6459 = vmatpush3.bf16.msra.mxu1 %v7147_v14  ;;  %6438 = vmatprep.subr.bf16.mxu0 %v7148_v15  ;;  %v7195_v14 = vld [vmem:[%s9322_s1 + $0x3d0] sm:$0xff]  }
  0x3e   :  { %6460 = vmatprep.subr.bf16.mxu1 %v7149_v18  ;;  %v7196_v15 = vld [vmem:[%s9322_s1 + $0x310] sm:$0xff]   ;;  %v7199_v18 = vld [vmem:[%s9322_s1 + $0x3d8] sm:$0xff]  }
  0x40   :  { %6439 = vmatpush3.bf16.msra.mxu0 %v7150_v19  ;;  %v7200_v19 = vld [vmem:[%s9322_s1 + $0x318] sm:$0xff]  }
  0x41   :  { %6461 = vmatpush3.bf16.msra.mxu1 %v7151_v22  ;;  %6468 = vmatprep.subr.bf16.mxu0 %v7153_v24  ;;  %v7203_v22 = vld [vmem:[%s9322_s1 + $0x3e0] sm:$0xff]  }
  0x42   :  { %6490 = vmatprep.subr.bf16.mxu1 %v7154_v25  ;;  %v7205_v24 = vld [vmem:[%s9322_s1 + $0x3a0] sm:$0xff]   ;;  %v7206_v25 = vld [vmem:[%s9322_s1 + $0x368] sm:$0xff]  }
  0x43   :  { %4663 = vmatmul.mubr.bf16.vlgmr.msra.gmra.mrb[4].mxu0 %v393_v27  ;;  %v7208_v27 = vld [vmem:[%s9322_s1 + $0x328] sm:$0xff]  }
  0x44   :  { %4703 = vmatmul.mubr.bf16.vlgmr.msra.gmra.mrb[4].mxu1 %v395_v28  ;;  %6469 = vmatpush3.bf16.msra.mxu0 %v7155_v26  ;;  %v7207_v26 = vld [vmem:[%s9322_s1 + $0x3e8] sm:$0xff]  }
  0x45   :  { %6491 = vmatpush3.bf16.msra.mxu1 %v7156_v29  ;;  %6470 = vmatprep.subr.bf16.mxu0 %v7157_v30  ;;  %v7209_v28 = vld [vmem:[%s9322_s1 + $0x3a8] sm:$0xff]   ;;  %v7210_v29 = vld [vmem:[%s9322_s1 + $0x370] sm:$0xff]  }
  0x46   :  { %6492 = vmatprep.subr.bf16.mxu1 %v7158_v31  ;;  %4742 = vmatprep.mubr.bf16.mxu0 %v398_v63  ;;  %v7211_v30 = vld [vmem:[%s9322_s1 + $0x3f0] sm:$0xff]   ;;  %v7234_v63 = vld [vmem:[%s9322_s1 + $0x498] sm:$0xff]  }
  0x47   :  { %4782 = vmatprep.mubr.bf16.mxu1 %v400_v2  ;;  %v7212_v31 = vld [vmem:[%s9322_s1 + $0x330] sm:$0xff]   ;;  %v7237_v2 = vld [vmem:[%s9322_s1 + $0x420] sm:$0xff]  }
  0x48   :  { %6471 = vmatpush3.bf16.msra.mxu0 %v7159_v32  ;;  %v24_v32 = vld [vmem:[%s9321_s0 + $0x18] sm:$0xff] }
  0x49   :  { %6493 = vmatpush3.bf16.msra.mxu1 %v7160_v33  ;;  %6472 = vmatprep.subr.bf16.mxu0 %v7161_v34  ;;  %v7213_v33 = vld [vmem:[%s9322_s1 + $0x3b0] sm:$0xff]   ;;  %v111_v34 = vrot.slane %v24_v32, %v7769_v41 }
  0x4a   :  { %6494 = vmatprep.subr.bf16.mxu1 %v7162_v35  ;;  %v104_v35 = vcombine.high %v24_v32, %v24_v32  ;;  %v7258_v32 = vld [vmem:[%s9322_s1 + $0x508] sm:$0xff]  }
  0x4c   :  { %6473 = vmatpush3.bf16.msra.mxu0 %v7163_v36  ;;  %v7214_v36 = vld [vmem:[%s9322_s1 + $0x378] sm:$0xff]  }
  0x4d   :  { %6495 = vmatpush3.bf16.msra.mxu1 %v7164_v37  ;;  %6474 = vmatprep.subr.bf16.mxu0 %v7165_v38  ;;  %v7215_v37 = vld [vmem:[%s9322_s1 + $0x3f8] sm:$0xff]   ;;  %v119_v38 = vcombine.high %v111_v34, %v111_v34 }
  0x4e   :  { %6496 = vmatprep.subr.bf16.mxu1 %v7166_v39  ;;  %v118_v39 = vrot.slane %v104_v35, %v7769_v41  ;;  %v7261_v35 = vld [vmem:[%s9322_s1 + $0x5d0] sm:$0xff]  }
  0x50   :  { %6475 = vmatpush3.bf16.msra.mxu0 %v7167_v40  ;;  %v7216_v40 = vld [vmem:[%s9322_s1 + $0x338] sm:$0xff]  }
  0x51   :  { %6497 = vmatpush3.bf16.msra.mxu1 %v7168_v42  ;;  %6476 = vmatprep.subr.bf16.mxu0 %v7169_v43  ;;  %v7217_v42 = vld [vmem:[%s9322_s1 + $0x3b8] sm:$0xff]   ;;  %v402_v43 = vpack.c.bf16 %v119_v38, %v119_v38 }
  0x52   :  { %6498 = vmatprep.subr.bf16.mxu1 %v7170_v44  ;;  %v120_v44 = vcombine.high %v118_v39, %v118_v39  ;;  %v7264_v38 = vld [vmem:[%s9322_s1 + $0x558] sm:$0xff]  }
  0x54   :  { %6477 = vmatpush3.bf16.msra.mxu0 %v7171_v45  ;;  %v7219_v45 = vld [vmem:[%s9322_s1 + $0x440] sm:$0xff]  }
  0x55   :  { %6499 = vmatpush3.bf16.msra.mxu1 %v7172_v46  ;;  %6478 = vmatprep.subr.bf16.mxu0 %v7173_v47  ;;  %v404_v46 = vpack.c.bf16 %v120_v44, %v120_v44  ;;  %v7220_v47 = vld [vmem:[%s9322_s1 + $0x4c0] sm:$0xff]  }
  0x56   :  { %6500 = vmatprep.subr.bf16.mxu1 %v7174_v48  ;;  %v7221_v48 = vld [vmem:[%s9322_s1 + $0x400] sm:$0xff]  }
  0x57   :  { %v7269_v44 = vld [vmem:[%s9322_s1 + $0x5e0] sm:$0xff]  }
  0x58   :  { %6479 = vmatpush3.bf16.msra.mxu0 %v7175_v49  ;;  %v401_v49 = vpack.c.bf16 %v111_v34, %v111_v34  ;;  %v7260_v34 = vld [vmem:[%s9322_s1 + $0x550] sm:$0xff]  }
  0x59   :  { %6501 = vmatpush3.bf16.msra.mxu1 %v7176_v50  ;;  %6480 = vmatprep.subr.bf16.mxu0 %v7177_v51  ;;  %v403_v50 = vpack.c.bf16 %v118_v39, %v118_v39  ;;  %v7222_v51 = vld [vmem:[%s9322_s1 + $0x480] sm:$0xff]   ;;  %v7265_v39 = vld [vmem:[%s9322_s1 + $0x5d8] sm:$0xff]  }
  0x5a   :  { %6502 = vmatprep.subr.bf16.mxu1 %v7178_v52  ;;  %v7223_v52 = vld [vmem:[%s9322_s1 + $0x448] sm:$0xff]  }
  0x5c   :  { %6481 = vmatpush3.bf16.msra.mxu0 %v7179_v54  ;;  %v7225_v54 = vld [vmem:[%s9322_s1 + $0x408] sm:$0xff]  }
  0x5d   :  { %6503 = vmatpush3.bf16.msra.mxu1 %v7180_v57  ;;  %6482 = vmatprep.subr.bf16.mxu0 %v7181_v58  ;;  %v7228_v57 = vld [vmem:[%s9322_s1 + $0x4d0] sm:$0xff]  }
  0x5e   :  { %6504 = vmatprep.subr.bf16.mxu1 %v7182_v61  ;;  %v7229_v58 = vld [vmem:[%s9322_s1 + $0x410] sm:$0xff]   ;;  %v7232_v61 = vld [vmem:[%s9322_s1 + $0x4d8] sm:$0xff]  }
  0x60   :  { %6483 = vmatpush3.bf16.msra.mxu0 %v7183_v62  ;;  %v7233_v62 = vld [vmem:[%s9322_s1 + $0x418] sm:$0xff]  }
  0x61   :  { %6505 = vmatpush3.bf16.msra.mxu1 %v7184_v1  ;;  %6512 = vmatprep.subr.bf16.mxu0 %v7186_v3  ;;  %v7236_v1 = vld [vmem:[%s9322_s1 + $0x4e0] sm:$0xff]  }
  0x62   :  { %6534 = vmatprep.subr.bf16.mxu1 %v7187_v4  ;;  %v7238_v3 = vld [vmem:[%s9322_s1 + $0x4a0] sm:$0xff]   ;;  %v7239_v4 = vld [vmem:[%s9322_s1 + $0x468] sm:$0xff]  }
  0x63   :  { %4743 = vmatmul.mubr.bf16.vlgmr.msra.gmra.mrb[8].mxu0 %v397_v6  ;;  %v7241_v6 = vld [vmem:[%s9322_s1 + $0x428] sm:$0xff]  }
  0x64   :  { %4783 = vmatmul.mubr.bf16.vlgmr.msra.gmra.mrb[8].mxu1 %v399_v7  ;;  %6513 = vmatpush3.bf16.msra.mxu0 %v7188_v5  ;;  %v7240_v5 = vld [vmem:[%s9322_s1 + $0x4e8] sm:$0xff]  }
  0x65   :  { %6535 = vmatpush3.bf16.msra.mxu1 %v7189_v8  ;;  %6514 = vmatprep.subr.bf16.mxu0 %v7190_v9  ;;  %v7242_v7 = vld [vmem:[%s9322_s1 + $0x4a8] sm:$0xff]   ;;  %v7243_v8 = vld [vmem:[%s9322_s1 + $0x470] sm:$0xff]  }
  0x66   :  { %6536 = vmatprep.subr.bf16.mxu1 %v7191_v10  ;;  %4822 = vmatprep.mubr.bf16.mxu0 %v402_v43  ;;  %v7244_v9 = vld [vmem:[%s9322_s1 + $0x4f0] sm:$0xff]   ;;  %v7268_v43 = vld [vmem:[%s9322_s1 + $0x560] sm:$0xff]  }
  0x67   :  { %4862 = vmatprep.mubr.bf16.mxu1 %v404_v46  ;;  %v7245_v10 = vld [vmem:[%s9322_s1 + $0x430] sm:$0xff]   ;;  %v7271_v46 = vld [vmem:[%s9322_s1 + $0x5a0] sm:$0xff]  }
  0x68   :  { %6515 = vmatpush3.bf16.msra.mxu0 %v7192_v11  ;;  %v25_v11 = vld [vmem:[%s9321_s0 + $0x20] sm:$0xff] }
  0x69   :  { %6537 = vmatpush3.bf16.msra.mxu1 %v7193_v12  ;;  %6516 = vmatprep.subr.bf16.mxu0 %v7194_v13  ;;  %v7246_v12 = vld [vmem:[%s9322_s1 + $0x4b0] sm:$0xff]   ;;  %v128_v13 = vrot.slane %v25_v11, %v7769_v41 }
  0x6a   :  { %6538 = vmatprep.subr.bf16.mxu1 %v7195_v14  ;;  %v121_v14 = vcombine.high %v25_v11, %v25_v11  ;;  %v7291_v11 = vld [vmem:[%s9322_s1 + $0x608] sm:$0xff]  }
  0x6c   :  { %6517 = vmatpush3.bf16.msra.mxu0 %v7196_v15  ;;  %v7247_v15 = vld [vmem:[%s9322_s1 + $0x478] sm:$0xff]  }
  0x6d   :  { %6539 = vmatpush3.bf16.msra.mxu1 %v7197_v16  ;;  %6518 = vmatprep.subr.bf16.mxu0 %v7198_v17  ;;  %v7248_v16 = vld [vmem:[%s9322_s1 + $0x4f8] sm:$0xff]   ;;  %v136_v17 = vcombine.high %v128_v13, %v128_v13 }
  0x6e   :  { %6540 = vmatprep.subr.bf16.mxu1 %v7199_v18  ;;  %v135_v18 = vrot.slane %v121_v14, %v7769_v41  ;;  %v7294_v14 = vld [vmem:[%s9322_s1 + $0x6d0] sm:$0xff]  }
  0x70   :  { %6519 = vmatpush3.bf16.msra.mxu0 %v7200_v19  ;;  %v7249_v19 = vld [vmem:[%s9322_s1 + $0x438] sm:$0xff]  }
  0x71   :  { %6541 = vmatpush3.bf16.msra.mxu1 %v7201_v20  ;;  %6520 = vmatprep.subr.bf16.mxu0 %v7202_v21  ;;  %v7250_v20 = vld [vmem:[%s9322_s1 + $0x4b8] sm:$0xff]   ;;  %v406_v21 = vpack.c.bf16 %v136_v17, %v136_v17 }
  0x72   :  { %6542 = vmatprep.subr.bf16.mxu1 %v7203_v22  ;;  %v137_v22 = vcombine.high %v135_v18, %v135_v18  ;;  %v7297_v17 = vld [vmem:[%s9322_s1 + $0x658] sm:$0xff]  }
  0x74   :  { %6521 = vmatpush3.bf16.msra.mxu0 %v7204_v23  ;;  %v7252_v23 = vld [vmem:[%s9322_s1 + $0x540] sm:$0xff]  }
  0x75   :  { %6543 = vmatpush3.bf16.msra.mxu1 %v7205_v24  ;;  %6522 = vmatprep.subr.bf16.mxu0 %v7206_v25  ;;  %v408_v24 = vpack.c.bf16 %v137_v22, %v137_v22  ;;  %v7253_v25 = vld [vmem:[%s9322_s1 + $0x5c0] sm:$0xff]  }
  0x76   :  { %6544 = vmatprep.subr.bf16.mxu1 %v7207_v26  ;;  %v7254_v26 = vld [vmem:[%s9322_s1 + $0x500] sm:$0xff]  }
  0x77   :  { %v7302_v22 = vld [vmem:[%s9322_s1 + $0x6e0] sm:$0xff]  }
  0x78   :  { %6523 = vmatpush3.bf16.msra.mxu0 %v7208_v27  ;;  %v405_v27 = vpack.c.bf16 %v128_v13, %v128_v13  ;;  %v7293_v13 = vld [vmem:[%s9322_s1 + $0x650] sm:$0xff]  }
  0x79   :  { %6545 = vmatpush3.bf16.msra.mxu1 %v7209_v28  ;;  %6524 = vmatprep.subr.bf16.mxu0 %v7210_v29  ;;  %v407_v28 = vpack.c.bf16 %v135_v18, %v135_v18  ;;  %v7255_v29 = vld [vmem:[%s9322_s1 + $0x580] sm:$0xff]   ;;  %v7298_v18 = vld [vmem:[%s9322_s1 + $0x6d8] sm:$0xff]  }
  0x7a   :  { %6546 = vmatprep.subr.bf16.mxu1 %v7211_v30  ;;  %v7256_v30 = vld [vmem:[%s9322_s1 + $0x548] sm:$0xff]  }
  0x7c   :  { %6525 = vmatpush3.bf16.msra.mxu0 %v7212_v31  ;;  %v7257_v31 = vld [vmem:[%s9322_s1 + $0x5c8] sm:$0xff]  }
  0x7d   :  { %6547 = vmatpush3.bf16.msra.mxu1 %v7213_v33  ;;  %6526 = vmatprep.subr.bf16.mxu0 %v7214_v36  ;;  %v7259_v33 = vld [vmem:[%s9322_s1 + $0x588] sm:$0xff]   ;;  %v7262_v36 = vld [vmem:[%s9322_s1 + $0x510] sm:$0xff]  }
  0x7e   :  { %6548 = vmatprep.subr.bf16.mxu1 %v7215_v37  ;;  %v7263_v37 = vld [vmem:[%s9322_s1 + $0x590] sm:$0xff]  }
  0x80   :  { %6527 = vmatpush3.bf16.msra.mxu0 %v7216_v40  ;;  %v7266_v40 = vld [vmem:[%s9322_s1 + $0x518] sm:$0xff]  }
  0x81   :  { %6549 = vmatpush3.bf16.msra.mxu1 %v7217_v42  ;;  %6556 = vmatprep.subr.bf16.mxu0 %v7219_v45  ;;  %v7267_v42 = vld [vmem:[%s9322_s1 + $0x598] sm:$0xff]   ;;  %v7270_v45 = vld [vmem:[%s9322_s1 + $0x520] sm:$0xff]  }
  0x82   :  { %6578 = vmatprep.subr.bf16.mxu1 %v7220_v47  ;;  %v7272_v47 = vld [vmem:[%s9322_s1 + $0x568] sm:$0xff]  }
  0x83   :  { %4823 = vmatmul.mubr.bf16.vlgmr.msra.gmra.mrb[12].mxu0 %v401_v49  ;;  %v7274_v49 = vld [vmem:[%s9322_s1 + $0x528] sm:$0xff]  }
  0x84   :  { %4863 = vmatmul.mubr.bf16.vlgmr.msra.gmra.mrb[12].mxu1 %v403_v50  ;;  %6557 = vmatpush3.bf16.msra.mxu0 %v7221_v48  ;;  %v7273_v48 = vld [vmem:[%s9322_s1 + $0x5e8] sm:$0xff]  }
  0x85   :  { %6579 = vmatpush3.bf16.msra.mxu1 %v7222_v51  ;;  %6558 = vmatprep.subr.bf16.mxu0 %v7223_v52  ;;  %v7275_v50 = vld [vmem:[%s9322_s1 + $0x5a8] sm:$0xff]   ;;  %v7276_v51 = vld [vmem:[%s9322_s1 + $0x570] sm:$0xff]  }
  0x86   :  { %6580 = vmatprep.subr.bf16.mxu1 %v7224_v53  ;;  %4902 = vmatprep.mubr.bf16.mxu0 %v406_v21  ;;  %v7277_v52 = vld [vmem:[%s9322_s1 + $0x5f0] sm:$0xff]   ;;  %v7301_v21 = vld [vmem:[%s9322_s1 + $0x660] sm:$0xff]  }
  0x87   :  { %4942 = vmatprep.mubr.bf16.mxu1 %v408_v24  ;;  %v7278_v53 = vld [vmem:[%s9322_s1 + $0x530] sm:$0xff]   ;;  %v7304_v24 = vld [vmem:[%s9322_s1 + $0x6a0] sm:$0xff]  }
  0x88   :  { %6559 = vmatpush3.bf16.msra.mxu0 %v7225_v54  ;;  %v26_v54 = vld [vmem:[%s9321_s0 + $0x28] sm:$0xff] }
  0x89   :  { %6581 = vmatpush3.bf16.msra.mxu1 %v7226_v55  ;;  %6560 = vmatprep.subr.bf16.mxu0 %v7227_v56  ;;  %v7279_v55 = vld [vmem:[%s9322_s1 + $0x5b0] sm:$0xff]   ;;  %v145_v56 = vrot.slane %v26_v54, %v7769_v41 }
  0x8a   :  { %6582 = vmatprep.subr.bf16.mxu1 %v7228_v57  ;;  %v138_v57 = vcombine.high %v26_v54, %v26_v54  ;;  %v7324_v54 = vld [vmem:[%s9322_s1 + $0x708] sm:$0xff]  }
  0x8c   :  { %6561 = vmatpush3.bf16.msra.mxu0 %v7229_v58  ;;  %v7280_v58 = vld [vmem:[%s9322_s1 + $0x578] sm:$0xff]  }
  0x8d   :  { %6583 = vmatpush3.bf16.msra.mxu1 %v7230_v59  ;;  %6562 = vmatprep.subr.bf16.mxu0 %v7231_v60  ;;  %v7281_v59 = vld [vmem:[%s9322_s1 + $0x5f8] sm:$0xff]   ;;  %v153_v60 = vcombine.high %v145_v56, %v145_v56 }
  0x8e   :  { %6584 = vmatprep.subr.bf16.mxu1 %v7232_v61  ;;  %v152_v61 = vrot.slane %v138_v57, %v7769_v41  ;;  %v7327_v57 = vld [vmem:[%s9322_s1 + $0x7d0] sm:$0xff]  }
  0x90   :  { %6563 = vmatpush3.bf16.msra.mxu0 %v7233_v62  ;;  %v7282_v62 = vld [vmem:[%s9322_s1 + $0x538] sm:$0xff]  }
  0x91   :  { %6585 = vmatpush3.bf16.msra.mxu1 %v7234_v63  ;;  %6564 = vmatprep.subr.bf16.mxu0 %v7235_v0  ;;  %v7283_v63 = vld [vmem:[%s9322_s1 + $0x5b8] sm:$0xff]   ;;  %v410_v0 = vpack.c.bf16 %v153_v60, %v153_v60 }
  0x92   :  { %6586 = vmatprep.subr.bf16.mxu1 %v7236_v1  ;;  %v154_v1 = vcombine.high %v152_v61, %v152_v61  ;;  %v7330_v60 = vld [vmem:[%s9322_s1 + $0x758] sm:$0xff]  }
  0x94   :  { %6565 = vmatpush3.bf16.msra.mxu0 %v7237_v2  ;;  %v7285_v2 = vld [vmem:[%s9322_s1 + $0x640] sm:$0xff]  }
  0x95   :  { %6587 = vmatpush3.bf16.msra.mxu1 %v7238_v3  ;;  %6566 = vmatprep.subr.bf16.mxu0 %v7239_v4  ;;  %v412_v3 = vpack.c.bf16 %v154_v1, %v154_v1  ;;  %v7286_v4 = vld [vmem:[%s9322_s1 + $0x6c0] sm:$0xff]  }
  0x96   :  { %6588 = vmatprep.subr.bf16.mxu1 %v7240_v5  ;;  %v7287_v5 = vld [vmem:[%s9322_s1 + $0x600] sm:$0xff]  }
  0x97   :  { %v7335_v1 = vld [vmem:[%s9322_s1 + $0x7e0] sm:$0xff]  }
  0x98   :  { %6567 = vmatpush3.bf16.msra.mxu0 %v7241_v6  ;;  %v409_v6 = vpack.c.bf16 %v145_v56, %v145_v56  ;;  %v7326_v56 = vld [vmem:[%s9322_s1 + $0x750] sm:$0xff]  }
  0x99   :  { %6589 = vmatpush3.bf16.msra.mxu1 %v7242_v7  ;;  %6568 = vmatprep.subr.bf16.mxu0 %v7243_v8  ;;  %v411_v7 = vpack.c.bf16 %v152_v61, %v152_v61  ;;  %v7288_v8 = vld [vmem:[%s9322_s1 + $0x680] sm:$0xff]   ;;  %v7331_v61 = vld [vmem:[%s9322_s1 + $0x7d8] sm:$0xff]  }
  0x9a   :  { %6590 = vmatprep.subr.bf16.mxu1 %v7244_v9  ;;  %v7289_v9 = vld [vmem:[%s9322_s1 + $0x648] sm:$0xff]  }
  0x9c   :  { %6569 = vmatpush3.bf16.msra.mxu0 %v7245_v10  ;;  %v7290_v10 = vld [vmem:[%s9322_s1 + $0x6c8] sm:$0xff]  }
  0x9d   :  { %6591 = vmatpush3.bf16.msra.mxu1 %v7246_v12  ;;  %6570 = vmatprep.subr.bf16.mxu0 %v7247_v15  ;;  %v7292_v12 = vld [vmem:[%s9322_s1 + $0x688] sm:$0xff]   ;;  %v7295_v15 = vld [vmem:[%s9322_s1 + $0x610] sm:$0xff]  }
  0x9e   :  { %6592 = vmatprep.subr.bf16.mxu1 %v7248_v16  ;;  %v7296_v16 = vld [vmem:[%s9322_s1 + $0x690] sm:$0xff]  }
  0xa0   :  { %6571 = vmatpush3.bf16.msra.mxu0 %v7249_v19  ;;  %v7299_v19 = vld [vmem:[%s9322_s1 + $0x618] sm:$0xff]  }
  0xa1   :  { %6593 = vmatpush3.bf16.msra.mxu1 %v7250_v20  ;;  %6600 = vmatprep.subr.bf16.mxu0 %v7252_v23  ;;  %v7300_v20 = vld [vmem:[%s9322_s1 + $0x698] sm:$0xff]   ;;  %v7303_v23 = vld [vmem:[%s9322_s1 + $0x620] sm:$0xff]  }
  0xa2   :  { %6622 = vmatprep.subr.bf16.mxu1 %v7253_v25  ;;  %v7305_v25 = vld [vmem:[%s9322_s1 + $0x668] sm:$0xff]  }
  0xa3   :  { %4903 = vmatmul.mubr.bf16.vlgmr.msra.gmra.mrb[16].mxu0 %v405_v27  ;;  %v7307_v27 = vld [vmem:[%s9322_s1 + $0x628] sm:$0xff]  }
  0xa4   :  { %4943 = vmatmul.mubr.bf16.vlgmr.msra.gmra.mrb[16].mxu1 %v407_v28  ;;  %6601 = vmatpush3.bf16.msra.mxu0 %v7254_v26  ;;  %v7306_v26 = vld [vmem:[%s9322_s1 + $0x6e8] sm:$0xff]  }
  0xa5   :  { %6623 = vmatpush3.bf16.msra.mxu1 %v7255_v29  ;;  %6602 = vmatprep.subr.bf16.mxu0 %v7256_v30  ;;  %v7308_v28 = vld [vmem:[%s9322_s1 + $0x6a8] sm:$0xff]   ;;  %v7309_v29 = vld [vmem:[%s9322_s1 + $0x670] sm:$0xff]  }
  0xa6   :  { %6624 = vmatprep.subr.bf16.mxu1 %v7257_v31  ;;  %4982 = vmatprep.mubr.bf16.mxu0 %v410_v0  ;;  %v7310_v30 = vld [vmem:[%s9322_s1 + $0x6f0] sm:$0xff]   ;;  %v7334_v0 = vld [vmem:[%s9322_s1 + $0x760] sm:$0xff]  }
  0xa7   :  { %5022 = vmatprep.mubr.bf16.mxu1 %v412_v3  ;;  %v7311_v31 = vld [vmem:[%s9322_s1 + $0x630] sm:$0xff]   ;;  %v7337_v3 = vld [vmem:[%s9322_s1 + $0x7a0] sm:$0xff]  }
  0xa8   :  { %6603 = vmatpush3.bf16.msra.mxu0 %v7258_v32  ;;  %v7312_v32 = vld [vmem:[%s9322_s1 + $0x6b0] sm:$0xff]  }
  0xa9   :  { %6625 = vmatpush3.bf16.msra.mxu1 %v7259_v33  ;;  %6604 = vmatprep.subr.bf16.mxu0 %v7260_v34  ;;  %v27_v33 = vld [vmem:[%s9321_s0 + $0x30] sm:$0xff]  ;;  %v7313_v34 = vld [vmem:[%s9322_s1 + $0x678] sm:$0xff]  }
  0xaa   :  { %6626 = vmatprep.subr.bf16.mxu1 %v7261_v35  ;;  %v162_v35 = vrot.slane %v27_v33, %v7769_v41 }
  0xac   :  { %6605 = vmatpush3.bf16.msra.mxu0 %v7262_v36  ;;  %v155_v36 = vcombine.high %v27_v33, %v27_v33  ;;  %v7351_v33 = vld [vmem:[%s9322_s1 + $0x840] sm:$0xff]  }
  0xad   :  { %6627 = vmatpush3.bf16.msra.mxu1 %v7263_v37  ;;  %6606 = vmatprep.subr.bf16.mxu0 %v7264_v38  ;;  %v7314_v37 = vld [vmem:[%s9322_s1 + $0x6f8] sm:$0xff]  }
  0xae   :  { %6628 = vmatprep.subr.bf16.mxu1 %v7265_v39  ;;  %v7315_v38 = vld [vmem:[%s9322_s1 + $0x638] sm:$0xff]   ;;  %v170_v39 = vcombine.high %v162_v35, %v162_v35 }
  0xb0   :  { %6607 = vmatpush3.bf16.msra.mxu0 %v7266_v40  ;;  %v169_v40 = vrot.slane %v155_v36, %v7769_v41  ;;  %v7353_v36 = vld [vmem:[%s9322_s1 + $0x800] sm:$0xff]  }
  0xb1   :  { %6629 = vmatpush3.bf16.msra.mxu1 %v7267_v42  ;;  %6608 = vmatprep.subr.bf16.mxu0 %v7268_v43  ;;  %v7316_v42 = vld [vmem:[%s9322_s1 + $0x6b8] sm:$0xff]   ;;  %v414_v43 = vpack.c.bf16 %v170_v39, %v170_v39 }
  0xb2   :  { %6630 = vmatprep.subr.bf16.mxu1 %v7269_v44  ;;  %v171_v44 = vcombine.high %v169_v40, %v169_v40 }
  0xb4   :  { %6609 = vmatpush3.bf16.msra.mxu0 %v7270_v45  ;;  %v7318_v45 = vld [vmem:[%s9322_s1 + $0x740] sm:$0xff]  }
  0xb5   :  { %6631 = vmatpush3.bf16.msra.mxu1 %v7271_v46  ;;  %6610 = vmatprep.subr.bf16.mxu0 %v7272_v47  ;;  %v7319_v46 = vld [vmem:[%s9322_s1 + $0x7c0] sm:$0xff]   ;;  %v416_v47 = vpack.c.bf16 %v171_v44, %v171_v44  ;;  %v7357_v44 = vld [vmem:[%s9322_s1 + $0x808] sm:$0xff]  }
  0xb6   :  { %6632 = vmatprep.subr.bf16.mxu1 %v7273_v48  ;;  %v7320_v48 = vld [vmem:[%s9322_s1 + $0x700] sm:$0xff]  }
  0xb8   :  { %6611 = vmatpush3.bf16.msra.mxu0 %v7274_v49  ;;  %v413_v49 = vpack.c.bf16 %v162_v35, %v162_v35  ;;  %v7352_v35 = vld [vmem:[%s9322_s1 + $0x8c0] sm:$0xff]  }
  0xb9   :  { %6633 = vmatpush3.bf16.msra.mxu1 %v7275_v50  ;;  %6612 = vmatprep.subr.bf16.mxu0 %v7276_v51  ;;  %v415_v50 = vpack.c.bf16 %v169_v40, %v169_v40  ;;  %v7321_v51 = vld [vmem:[%s9322_s1 + $0x780] sm:$0xff]  }
  0xba   :  { %6634 = vmatprep.subr.bf16.mxu1 %v7277_v52  ;;  %v7322_v52 = vld [vmem:[%s9322_s1 + $0x748] sm:$0xff]   ;;  %v7354_v40 = vld [vmem:[%s9322_s1 + $0x880] sm:$0xff]  }
  0xbc   :  { %6613 = vmatpush3.bf16.msra.mxu0 %v7278_v53  ;;  %v7323_v53 = vld [vmem:[%s9322_s1 + $0x7c8] sm:$0xff]  }
  0xbd   :  { %6635 = vmatpush3.bf16.msra.mxu1 %v7279_v55  ;;  %6614 = vmatprep.subr.bf16.mxu0 %v7280_v58  ;;  %v7325_v55 = vld [vmem:[%s9322_s1 + $0x788] sm:$0xff]   ;;  %v7328_v58 = vld [vmem:[%s9322_s1 + $0x710] sm:$0xff]  }
  0xbe   :  { %6636 = vmatprep.subr.bf16.mxu1 %v7281_v59  ;;  %v7329_v59 = vld [vmem:[%s9322_s1 + $0x790] sm:$0xff]  }
  0xc0   :  { %6615 = vmatpush3.bf16.msra.mxu0 %v7282_v62  ;;  %v7332_v62 = vld [vmem:[%s9322_s1 + $0x718] sm:$0xff]  }
  0xc1   :  { %6637 = vmatpush3.bf16.msra.mxu1 %v7283_v63  ;;  %6644 = vmatprep.subr.bf16.mxu0 %v7285_v2  ;;  %v7333_v63 = vld [vmem:[%s9322_s1 + $0x798] sm:$0xff]   ;;  %v7336_v2 = vld [vmem:[%s9322_s1 + $0x720] sm:$0xff]  }
  0xc2   :  { %6666 = vmatprep.subr.bf16.mxu1 %v7286_v4  ;;  %v7338_v4 = vld [vmem:[%s9322_s1 + $0x768] sm:$0xff]  }
  0xc3   :  { %4983 = vmatmul.mubr.bf16.vlgmr.msra.gmra.mrb[20].mxu0 %v409_v6  ;;  %v7340_v6 = vld [vmem:[%s9322_s1 + $0x728] sm:$0xff]  }
  0xc4   :  { %5023 = vmatmul.mubr.bf16.vlgmr.msra.gmra.mrb[20].mxu1 %v411_v7  ;;  %6645 = vmatpush3.bf16.msra.mxu0 %v7287_v5  ;;  %v7339_v5 = vld [vmem:[%s9322_s1 + $0x7e8] sm:$0xff]  }
  0xc5   :  { %6667 = vmatpush3.bf16.msra.mxu1 %v7288_v8  ;;  %6646 = vmatprep.subr.bf16.mxu0 %v7289_v9  ;;  %v7341_v7 = vld [vmem:[%s9322_s1 + $0x7a8] sm:$0xff]   ;;  %v7342_v8 = vld [vmem:[%s9322_s1 + $0x770] sm:$0xff]  }
  0xc6   :  { %6668 = vmatprep.subr.bf16.mxu1 %v7290_v10  ;;  %5062 = vmatprep.mubr.bf16.mxu0 %v414_v43  ;;  %v7343_v9 = vld [vmem:[%s9322_s1 + $0x7f0] sm:$0xff]   ;;  %v7356_v43 = vld [vmem:[%s9322_s1 + $0x8c8] sm:$0xff]  }
  0xc7   :  { %5102 = vmatprep.mubr.bf16.mxu1 %v416_v47  ;;  %v7360_v47 = vld [vmem:[%s9322_s1 + $0x8d0] sm:$0xff]  }
  0xc8   :  { %6647 = vmatpush3.bf16.msra.mxu0 %v7291_v11 }
  0xc9   :  { %6669 = vmatpush3.bf16.msra.mxu1 %v7292_v12  ;;  %6648 = vmatprep.subr.bf16.mxu0 %v7293_v13  ;;  %v7344_v12 = vld [vmem:[%s9322_s1 + $0x730] sm:$0xff]  }
  0xca   :  { %6670 = vmatprep.subr.bf16.mxu1 %v7294_v14  ;;  %v7345_v13 = vld [vmem:[%s9322_s1 + $0x7b0] sm:$0xff]  }
  0xcc   :  { %6649 = vmatpush3.bf16.msra.mxu0 %v7295_v15 }
  0xcd   :  { %6671 = vmatpush3.bf16.msra.mxu1 %v7296_v16  ;;  %6650 = vmatprep.subr.bf16.mxu0 %v7297_v17  ;;  %v7346_v16 = vld [vmem:[%s9322_s1 + $0x778] sm:$0xff]  }
  0xce   :  { %6672 = vmatprep.subr.bf16.mxu1 %v7298_v18  ;;  %v7347_v17 = vld [vmem:[%s9322_s1 + $0x7f8] sm:$0xff]  }
  0xcf   :  { %v28_v18 = vld [vmem:[%s9321_s0 + $0x38] sm:$0xff] }
  0xd0   :  { %6651 = vmatpush3.bf16.msra.mxu0 %v7299_v19 }
  0xd1   :  { %6673 = vmatpush3.bf16.msra.mxu1 %v7300_v20  ;;  %6652 = vmatprep.subr.bf16.mxu0 %v7301_v21 }
  0xd2   :  { %6674 = vmatprep.subr.bf16.mxu1 %v7302_v22 }
  0xd4   :  { %6653 = vmatpush3.bf16.msra.mxu0 %v7303_v23  ;;  %v179_v23 = vrot.slane %v28_v18, %v7769_v41 }
  0xd5   :  { %6675 = vmatpush3.bf16.msra.mxu1 %v7304_v24  ;;  %6654 = vmatprep.subr.bf16.mxu0 %v7305_v25 }
  0xd6   :  { %6676 = vmatprep.subr.bf16.mxu1 %v7306_v26  ;;  %v172_v26 = vcombine.high %v28_v18, %v28_v18  ;;  %v7381_v18 = vld [vmem:[%s9322_s1 + $0x838] sm:$0xff]  }
  0xd8   :  { %6655 = vmatpush3.bf16.msra.mxu0 %v7307_v27 }
  0xd9   :  { %6677 = vmatpush3.bf16.msra.mxu1 %v7308_v28  ;;  %6656 = vmatprep.subr.bf16.mxu0 %v7309_v29  ;;  %v7348_v28 = vld [vmem:[%s9322_s1 + $0x738] sm:$0xff]   ;;  %v187_v29 = vcombine.high %v179_v23, %v179_v23 }
  0xda   :  { %6678 = vmatprep.subr.bf16.mxu1 %v7310_v30  ;;  %v7349_v30 = vld [vmem:[%s9322_s1 + $0x7b8] sm:$0xff]  }
  0xdc   :  { %6657 = vmatpush3.bf16.msra.mxu0 %v7311_v31  ;;  %v186_v31 = vrot.slane %v172_v26, %v7769_v41  ;;  %v7385_v26 = vld [vmem:[%s9322_s1 + $0x9c0] sm:$0xff]  }
  0xdd   :  { %6679 = vmatpush3.bf16.msra.mxu1 %v7312_v32  ;;  %6658 = vmatprep.subr.bf16.mxu0 %v7313_v34  ;;  %v418_v32 = vpack.c.bf16 %v187_v29, %v187_v29 }
  0xde   :  { %6680 = vmatprep.subr.bf16.mxu1 %v7314_v37  ;;  %v188_v34 = vcombine.high %v186_v31, %v186_v31  ;;  %v419_v39 = vpack.c.bf16 %v186_v31, %v186_v31  ;;  %v7387_v31 = vld [vmem:[%s9322_s1 + $0x980] sm:$0xff]  }
  0xe0   :  { %6659 = vmatpush3.bf16.msra.mxu0 %v7315_v38  ;;  %v420_v37 = vpack.c.bf16 %v188_v34, %v188_v34  ;;  %v417_v38 = vpack.c.bf16 %v179_v23, %v179_v23  ;;  %v7384_v23 = vld [vmem:[%s9322_s1 + $0x940] sm:$0xff]   ;;  %v7390_v34 = vld [vmem:[%s9322_s1 + $0x908] sm:$0xff]  }
  0xe1   :  { %6681 = vmatpush3.bf16.msra.mxu1 %v7316_v42  ;;  %6688 = vmatprep.subr.bf16.mxu0 %v7318_v45  ;;  %v7355_v42 = vld [vmem:[%s9322_s1 + $0x848] sm:$0xff]  }
  0xe2   :  { %6710 = vmatprep.subr.bf16.mxu1 %v7319_v46  ;;  %v7358_v45 = vld [vmem:[%s9322_s1 + $0x888] sm:$0xff]   ;;  %v7359_v46 = vld [vmem:[%s9322_s1 + $0x850] sm:$0xff]  }
  0xe3   :  { %5063 = vmatmul.mubr.bf16.vlgmr.msra.gmra.mrb[24].mxu0 %v413_v49  ;;  %v7362_v49 = vld [vmem:[%s9322_s1 + $0x890] sm:$0xff]  }
  0xe4   :  { %5103 = vmatmul.mubr.bf16.vlgmr.msra.gmra.mrb[24].mxu1 %v415_v50  ;;  %6689 = vmatpush3.bf16.msra.mxu0 %v7320_v48  ;;  %v7361_v48 = vld [vmem:[%s9322_s1 + $0x810] sm:$0xff]   ;;  %v7363_v50 = vld [vmem:[%s9322_s1 + $0x858] sm:$0xff]  }
  0xe5   :  { %6711 = vmatpush3.bf16.msra.mxu1 %v7321_v51  ;;  %6690 = vmatprep.subr.bf16.mxu0 %v7322_v52  ;;  %v7364_v51 = vld [vmem:[%s9322_s1 + $0x8d8] sm:$0xff]  }
  0xe6   :  { %6712 = vmatprep.subr.bf16.mxu1 %v7323_v53  ;;  %5142 = vmatprep.mubr.bf16.mxu0 %v418_v32  ;;  %v7365_v52 = vld [vmem:[%s9322_s1 + $0x818] sm:$0xff]   ;;  %v7388_v32 = vld [vmem:[%s9322_s1 + $0x948] sm:$0xff]  }
  0xe7   :  { %5182 = vmatprep.mubr.bf16.mxu1 %v420_v37  ;;  %v7366_v53 = vld [vmem:[%s9322_s1 + $0x898] sm:$0xff]   ;;  %v7393_v37 = vld [vmem:[%s9322_s1 + $0x9d0] sm:$0xff]  }
  0xe8   :  { %6691 = vmatpush3.bf16.msra.mxu0 %v7324_v54  ;;  %v7367_v54 = vld [vmem:[%s9322_s1 + $0x860] sm:$0xff]  }
  0xe9   :  { %6713 = vmatpush3.bf16.msra.mxu1 %v7325_v55  ;;  %6692 = vmatprep.subr.bf16.mxu0 %v7326_v56  ;;  %v7368_v55 = vld [vmem:[%s9322_s1 + $0x8e0] sm:$0xff]  }
  0xea   :  { %6714 = vmatprep.subr.bf16.mxu1 %v7327_v57  ;;  %v7369_v56 = vld [vmem:[%s9322_s1 + $0x820] sm:$0xff]  }
  0xeb   :  { %v7370_v57 = vld [vmem:[%s9322_s1 + $0x8a0] sm:$0xff]  }
  0xec   :  { %6693 = vmatpush3.bf16.msra.mxu0 %v7328_v58  ;;  %v7371_v58 = vld [vmem:[%s9322_s1 + $0x868] sm:$0xff]  }
  0xed   :  { %6715 = vmatpush3.bf16.msra.mxu1 %v7329_v59  ;;  %6694 = vmatprep.subr.bf16.mxu0 %v7330_v60  ;;  %v7372_v59 = vld [vmem:[%s9322_s1 + $0x8e8] sm:$0xff]  }
  0xee   :  { %6716 = vmatprep.subr.bf16.mxu1 %v7331_v61  ;;  %v7373_v60 = vld [vmem:[%s9322_s1 + $0x828] sm:$0xff]  }
  0xef   :  { %v7374_v61 = vld [vmem:[%s9322_s1 + $0x8a8] sm:$0xff]  }
  0xf0   :  { %6695 = vmatpush3.bf16.msra.mxu0 %v7332_v62  ;;  %v7375_v62 = vld [vmem:[%s9322_s1 + $0x870] sm:$0xff]  }
  0xf1   :  { %6717 = vmatpush3.bf16.msra.mxu1 %v7333_v63  ;;  %6696 = vmatprep.subr.bf16.mxu0 %v7334_v0  ;;  %v7376_v63 = vld [vmem:[%s9322_s1 + $0x8f0] sm:$0xff]  }
  0xf2   :  { %6718 = vmatprep.subr.bf16.mxu1 %v7335_v1 }
  0xf4   :  { %6697 = vmatpush3.bf16.msra.mxu0 %v7336_v2  ;;  %v7377_v2 = vld [vmem:[%s9322_s1 + $0x830] sm:$0xff]  }
  0xf5   :  { %6719 = vmatpush3.bf16.msra.mxu1 %v7337_v3  ;;  %6698 = vmatprep.subr.bf16.mxu0 %v7338_v4  ;;  %v7378_v3 = vld [vmem:[%s9322_s1 + $0x8b0] sm:$0xff]  }
  0xf6   :  { %6720 = vmatprep.subr.bf16.mxu1 %v7339_v5  ;;  %v6396_v10 = vpop.f32.mrb[0].mxu0 }
  0xf7   :  { %v6418_v11 = vpop.f32.mrb[0].mxu1  ;;  %v6397_v14 = vpop.f32.mrb[1].mxu0 }
  0xf8   :  { %v6419_v15 = vpop.f32.mrb[1].mxu1  ;;  %v6398_v19 = vadd.f32 %v6397_v14, %v6396_v10  ;;  %v6399_v21 = vpop.f32.mrb[2].mxu0  ;;  %6699 = vmatpush3.bf16.msra.mxu0 %v7340_v6  ;;  %v7379_v6 = vld [vmem:[%s9322_s1 + $0x878] sm:$0xff]  }
  0xf9   :  { %v6420_v20 = vadd.f32 %v6419_v15, %v6418_v11  ;;  %v6421_v22 = vpop.f32.mrb[2].mxu1  ;;  %6721 = vmatpush3.bf16.msra.mxu1 %v7341_v7  ;;  %v6400_v24 = vpop.f32.mrb[3].mxu0  ;;  %6700 = vmatprep.subr.bf16.mxu0 %v7342_v8  ;;  %v7380_v11 = vld [vmem:[%s9322_s1 + $0x8f8] sm:$0xff]  }
  0xfa   :  { %v6422_v25 = vpop.f32.mrb[3].mxu1  ;;  %6722 = vmatprep.subr.bf16.mxu1 %v7343_v9 }
  0xfb   :  { %v8467_v27 = vadd.f32 %v6420_v20, %v6398_v19  ;;  %v7382_v19 = vld [vmem:[%s9322_s1 + $0x8b8] sm:$0xff]  }
  0xfc   :  { %6701 = vmatpush3.bf16.msra.mxu0 %v7344_v12  ;;  %v29_v12 = vld [vmem:[%s9321_s0 + $0x40] sm:$0xff] }
  0xfd   :  { %6723 = vmatpush3.bf16.msra.mxu1 %v7345_v13  ;;  %6702 = vmatprep.subr.bf16.mxu0 %v7346_v16  ;;  %v196_v15 = vrot.slane %v29_v12, %v7769_v41  ;;  %v189_v16 = vcombine.high %v29_v12, %v29_v12 }
  0xfe   :  { %6724 = vmatprep.subr.bf16.mxu1 %v7347_v17 }
  0xff   :  { %v204_v20 = vcombine.high %v196_v15, %v196_v15  ;;  %v203_v21 = vrot.slane %v189_v16, %v7769_v41  ;;  %v421_v29 = vpack.c.bf16 %v196_v15, %v196_v15  ;;  %v7418_v15 = vld [vmem:[%s9322_s1 + $0xac0] sm:$0xff]  }
 0x100   :  { %6703 = vmatpush3.bf16.msra.mxu0 %v7348_v28 }
 0x101   :  { %6725 = vmatpush3.bf16.msra.mxu1 %v7349_v30  ;;  %6732 = vmatprep.subr.bf16.mxu0 %v7351_v33  ;;  %v422_v24 = vpack.c.bf16 %v204_v20, %v204_v20  ;;  %v205_v25 = vcombine.high %v203_v21, %v203_v21  ;;  %v423_v30 = vpack.c.bf16 %v203_v21, %v203_v21  ;;  %v7389_v33 = vld [vmem:[%s9322_s1 + $0x9c8] sm:$0xff]   ;;  %v7420_v21 = vld [vmem:[%s9322_s1 + $0xa80] sm:$0xff]  }
 0x102   :  { %6754 = vmatprep.subr.bf16.mxu1 %v7352_v35  ;;  %v7391_v35 = vld [vmem:[%s9322_s1 + $0x988] sm:$0xff]  }
 0x103   :  { %5143 = vmatmul.mubr.bf16.vlgmr.msra.gmra.mrb[28].mxu0 %v417_v38  ;;  %v424_v28 = vpack.c.bf16 %v205_v25, %v205_v25  ;;  %v7394_v38 = vld [vmem:[%s9322_s1 + $0x910] sm:$0xff]   ;;  %v7423_v25 = vld [vmem:[%s9322_s1 + $0xa08] sm:$0xff]  }
 0x104   :  { %5183 = vmatmul.mubr.bf16.vlgmr.msra.gmra.mrb[28].mxu1 %v419_v39  ;;  %6733 = vmatpush3.bf16.msra.mxu0 %v7353_v36  ;;  %v7392_v36 = vld [vmem:[%s9322_s1 + $0x950] sm:$0xff]  }
 0x105   :  { %6755 = vmatpush3.bf16.msra.mxu1 %v7354_v40  ;;  %6734 = vmatprep.subr.bf16.mxu0 %v7355_v42  ;;  %v7395_v39 = vld [vmem:[%s9322_s1 + $0x990] sm:$0xff]   ;;  %v7396_v40 = vld [vmem:[%s9322_s1 + $0x958] sm:$0xff]  }
 0x106   :  { %6756 = vmatprep.subr.bf16.mxu1 %v7356_v43  ;;  %5222 = vmatprep.mubr.bf16.mxu0 %v422_v24  ;;  %v7397_v42 = vld [vmem:[%s9322_s1 + $0x9d8] sm:$0xff]   ;;  %v7422_v24 = vld [vmem:[%s9322_s1 + $0xac8] sm:$0xff]  }
 0x107   :  { %5262 = vmatprep.mubr.bf16.mxu1 %v424_v28  ;;  %v7398_v43 = vld [vmem:[%s9322_s1 + $0x918] sm:$0xff]   ;;  %v7426_v28 = vld [vmem:[%s9322_s1 + $0xad0] sm:$0xff]  }
 0x108   :  { %6735 = vmatpush3.bf16.msra.mxu0 %v7357_v44  ;;  %v7399_v44 = vld [vmem:[%s9322_s1 + $0x998] sm:$0xff]  }
 0x109   :  { %6757 = vmatpush3.bf16.msra.mxu1 %v7358_v45  ;;  %6736 = vmatprep.subr.bf16.mxu0 %v7359_v46  ;;  %v7400_v45 = vld [vmem:[%s9322_s1 + $0x960] sm:$0xff]  }
 0x10a   :  { %6758 = vmatprep.subr.bf16.mxu1 %v7360_v47  ;;  %v7401_v46 = vld [vmem:[%s9322_s1 + $0x9e0] sm:$0xff]  }
 0x10b   :  { %v7402_v47 = vld [vmem:[%s9322_s1 + $0x920] sm:$0xff]  }
 0x10c   :  { %6737 = vmatpush3.bf16.msra.mxu0 %v7361_v48  ;;  %v7403_v48 = vld [vmem:[%s9322_s1 + $0x9a0] sm:$0xff]  }
 0x10d   :  { %6759 = vmatpush3.bf16.msra.mxu1 %v7362_v49  ;;  %6738 = vmatprep.subr.bf16.mxu0 %v7363_v50  ;;  %v7404_v49 = vld [vmem:[%s9322_s1 + $0x968] sm:$0xff]  }
 0x10e   :  { %6760 = vmatprep.subr.bf16.mxu1 %v7364_v51  ;;  %v7405_v50 = vld [vmem:[%s9322_s1 + $0x9e8] sm:$0xff]  }
 0x10f   :  { %v7406_v51 = vld [vmem:[%s9322_s1 + $0x928] sm:$0xff]  }
 0x110   :  { %6739 = vmatpush3.bf16.msra.mxu0 %v7365_v52  ;;  %v7407_v52 = vld [vmem:[%s9322_s1 + $0x9a8] sm:$0xff]  }
 0x111   :  { %6761 = vmatpush3.bf16.msra.mxu1 %v7366_v53  ;;  %6740 = vmatprep.subr.bf16.mxu0 %v7367_v54  ;;  %v7408_v53 = vld [vmem:[%s9322_s1 + $0x970] sm:$0xff]  }
 0x112   :  { %6762 = vmatprep.subr.bf16.mxu1 %v7368_v55  ;;  %v7409_v54 = vld [vmem:[%s9322_s1 + $0x9f0] sm:$0xff]  }
 0x114   :  { %6741 = vmatpush3.bf16.msra.mxu0 %v7369_v56 }
 0x115   :  { %6763 = vmatpush3.bf16.msra.mxu1 %v7370_v57  ;;  %6742 = vmatprep.subr.bf16.mxu0 %v7371_v58  ;;  %v7410_v57 = vld [vmem:[%s9322_s1 + $0x930] sm:$0xff]  }
 0x116   :  { %6764 = vmatprep.subr.bf16.mxu1 %v7372_v59  ;;  %v6440_v0 = vpop.f32.mrb[4].mxu0  ;;  %v7411_v58 = vld [vmem:[%s9322_s1 + $0x9b0] sm:$0xff]  }
 0x117   :  { %v6462_v1 = vpop.f32.mrb[4].mxu1  ;;  %v6441_v4 = vpop.f32.mrb[5].mxu0 }
 0x118   :  { %v6463_v5 = vpop.f32.mrb[5].mxu1  ;;  %v6442_v7 = vadd.f32 %v6441_v4, %v6440_v0  ;;  %v6443_v9 = vpop.f32.mrb[6].mxu0  ;;  %6743 = vmatpush3.bf16.msra.mxu0 %v7373_v60 }
 0x119   :  { %v6464_v8 = vadd.f32 %v6463_v5, %v6462_v1  ;;  %v6465_v10 = vpop.f32.mrb[6].mxu1  ;;  %6765 = vmatpush3.bf16.msra.mxu1 %v7374_v61  ;;  %v6444_v13 = vpop.f32.mrb[7].mxu0  ;;  %6744 = vmatprep.subr.bf16.mxu0 %v7375_v62  ;;  %v7412_v1 = vld [vmem:[%s9322_s1 + $0x978] sm:$0xff]  }
 0x11a   :  { %v6466_v14 = vpop.f32.mrb[7].mxu1  ;;  %6766 = vmatprep.subr.bf16.mxu1 %v7376_v63  ;;  %v4665_v17 = vadd.f32 %v6442_v7, %v8467_v27  ;;  %v7386_v27 = vld [vmem:[%s9322_s1 + $0x900] sm:$0xff]   ;;  %v7414_v7 = vld [vmem:[%s9322_s1 + $0x938] sm:$0xff]  }
 0x11b   :  { %v7417_v14 = vld [vmem:[%s9322_s1 + $0xa40] sm:$0xff]  }
 0x11c   :  { %v8578_v22 = vadd.f32 %v6464_v8, %v4665_v17  ;;  %6745 = vmatpush3.bf16.msra.mxu0 %v7377_v2  ;;  %v7413_v2 = vld [vmem:[%s9322_s1 + $0x9f8] sm:$0xff]  }
 0x11d   :  { %6767 = vmatpush3.bf16.msra.mxu1 %v7378_v3  ;;  %6746 = vmatprep.subr.bf16.mxu0 %v7379_v6  ;;  %v30_v6 = vld [vmem:[%s9321_s0 + $0x48] sm:$0xff] }
 0x11e   :  { %6768 = vmatprep.subr.bf16.mxu1 %v7380_v11  ;;  %v213_v8 = vrot.slane %v30_v6, %v7769_v41  ;;  %v206_v9 = vcombine.high %v30_v6, %v30_v6  ;;  %v7415_v11 = vld [vmem:[%s9322_s1 + $0x9b8] sm:$0xff]   ;;  %v7451_v6 = vld [vmem:[%s9322_s1 + $0xbc0] sm:$0xff]  }
 0x120   :  { %6747 = vmatpush3.bf16.msra.mxu0 %v7381_v18  ;;  %v221_v12 = vcombine.high %v213_v8, %v213_v8  ;;  %v220_v13 = vrot.slane %v206_v9, %v7769_v41  ;;  %v425_v18 = vpack.c.bf16 %v213_v8, %v213_v8  ;;  %v7452_v8 = vld [vmem:[%s9322_s1 + $0xb00] sm:$0xff]  }
 0x121   :  { %6769 = vmatpush3.bf16.msra.mxu1 %v7382_v19  ;;  %6776 = vmatprep.subr.bf16.mxu0 %v7384_v23  ;;  %v7419_v19 = vld [vmem:[%s9322_s1 + $0xa00] sm:$0xff]   ;;  %v7421_v23 = vld [vmem:[%s9322_s1 + $0xa48] sm:$0xff]  }
 0x122   :  { %6798 = vmatprep.subr.bf16.mxu1 %v7385_v26  ;;  %v426_v16 = vpack.c.bf16 %v221_v12, %v221_v12  ;;  %v222_v17 = vcombine.high %v220_v13, %v220_v13  ;;  %v427_v20 = vpack.c.bf16 %v220_v13, %v220_v13  ;;  %v7424_v26 = vld [vmem:[%s9322_s1 + $0xa88] sm:$0xff]  }
 0x123   :  { %5223 = vmatmul.mubr.bf16.vlgmr.msra.gmra.mrb[32].mxu0 %v421_v29  ;;  %v7427_v29 = vld [vmem:[%s9322_s1 + $0xa10] sm:$0xff]   ;;  %v7454_v13 = vld [vmem:[%s9322_s1 + $0xb48] sm:$0xff]  }
 0x124   :  { %5263 = vmatmul.mubr.bf16.vlgmr.msra.gmra.mrb[32].mxu1 %v423_v30  ;;  %6777 = vmatpush3.bf16.msra.mxu0 %v7386_v27  ;;  %v7425_v27 = vld [vmem:[%s9322_s1 + $0xa50] sm:$0xff]  }
 0x125   :  { %6799 = vmatpush3.bf16.msra.mxu1 %v7387_v31  ;;  %6778 = vmatprep.subr.bf16.mxu0 %v7388_v32  ;;  %v7428_v30 = vld [vmem:[%s9322_s1 + $0xa90] sm:$0xff]   ;;  %v7429_v31 = vld [vmem:[%s9322_s1 + $0xa58] sm:$0xff]  }
 0x126   :  { %6800 = vmatprep.subr.bf16.mxu1 %v7389_v33  ;;  %5302 = vmatprep.mubr.bf16.mxu0 %v426_v16  ;;  %v7430_v32 = vld [vmem:[%s9322_s1 + $0xad8] sm:$0xff]   ;;  %v7456_v16 = vld [vmem:[%s9322_s1 + $0xb08] sm:$0xff]  }
 0x127   :  { %v7431_v33 = vld [vmem:[%s9322_s1 + $0xa18] sm:$0xff]  }
 0x128   :  { %6779 = vmatpush3.bf16.msra.mxu0 %v7390_v34  ;;  %v7432_v34 = vld [vmem:[%s9322_s1 + $0xa98] sm:$0xff]  }
 0x129   :  { %6801 = vmatpush3.bf16.msra.mxu1 %v7391_v35  ;;  %6780 = vmatprep.subr.bf16.mxu0 %v7392_v36  ;;  %v7433_v35 = vld [vmem:[%s9322_s1 + $0xa60] sm:$0xff]  }
 0x12a   :  { %6802 = vmatprep.subr.bf16.mxu1 %v7393_v37  ;;  %v7434_v36 = vld [vmem:[%s9322_s1 + $0xae0] sm:$0xff]  }
 0x12b   :  { %v7435_v37 = vld [vmem:[%s9322_s1 + $0xa20] sm:$0xff]  }
 0x12c   :  { %6781 = vmatpush3.bf16.msra.mxu0 %v7394_v38  ;;  %v7436_v38 = vld [vmem:[%s9322_s1 + $0xaa0] sm:$0xff]  }
 0x12d   :  { %6803 = vmatpush3.bf16.msra.mxu1 %v7395_v39  ;;  %6782 = vmatprep.subr.bf16.mxu0 %v7396_v40  ;;  %v7437_v39 = vld [vmem:[%s9322_s1 + $0xa68] sm:$0xff]  }
 0x12e   :  { %6804 = vmatprep.subr.bf16.mxu1 %v7397_v42  ;;  %v7438_v40 = vld [vmem:[%s9322_s1 + $0xae8] sm:$0xff]  }
 0x12f   :  { %v7439_v42 = vld [vmem:[%s9322_s1 + $0xa28] sm:$0xff]  }
 0x130   :  { %6783 = vmatpush3.bf16.msra.mxu0 %v7398_v43  ;;  %v7440_v43 = vld [vmem:[%s9322_s1 + $0xaa8] sm:$0xff]  }
 0x131   :  { %6805 = vmatpush3.bf16.msra.mxu1 %v7399_v44  ;;  %6784 = vmatprep.subr.bf16.mxu0 %v7400_v45  ;;  %v7441_v44 = vld [vmem:[%s9322_s1 + $0xa70] sm:$0xff]  }
 0x132   :  { %6806 = vmatprep.subr.bf16.mxu1 %v7401_v46 }
 0x134   :  { %6785 = vmatpush3.bf16.msra.mxu0 %v7402_v47  ;;  %v7442_v47 = vld [vmem:[%s9322_s1 + $0xaf0] sm:$0xff]  }
 0x135   :  { %6807 = vmatpush3.bf16.msra.mxu1 %v7403_v48  ;;  %6786 = vmatprep.subr.bf16.mxu0 %v7404_v49  ;;  %v7443_v48 = vld [vmem:[%s9322_s1 + $0xa30] sm:$0xff]  }
 0x136   :  { %6808 = vmatprep.subr.bf16.mxu1 %v7405_v50  ;;  %v6484_v55 = vpop.f32.mrb[8].mxu0 }
 0x137   :  { %v6506_v56 = vpop.f32.mrb[8].mxu1  ;;  %v6485_v59 = vpop.f32.mrb[9].mxu0 }
 0x138   :  { %v6507_v60 = vpop.f32.mrb[9].mxu1  ;;  %v6486_v61 = vadd.f32 %v6485_v59, %v6484_v55  ;;  %v6487_v63 = vpop.f32.mrb[10].mxu0  ;;  %6787 = vmatpush3.bf16.msra.mxu0 %v7406_v51  ;;  %v7444_v51 = vld [vmem:[%s9322_s1 + $0xab0] sm:$0xff]  }
 0x139   :  { %v6508_v62 = vadd.f32 %v6507_v60, %v6506_v56  ;;  %v6509_v0 = vpop.f32.mrb[10].mxu1  ;;  %6809 = vmatpush3.bf16.msra.mxu1 %v7407_v52  ;;  %v6488_v3 = vpop.f32.mrb[11].mxu0  ;;  %6788 = vmatprep.subr.bf16.mxu0 %v7408_v53  ;;  %v7445_v56 = vld [vmem:[%s9322_s1 + $0xa78] sm:$0xff]  }
 0x13a   :  { %v6510_v4 = vpop.f32.mrb[11].mxu1  ;;  %6810 = vmatprep.subr.bf16.mxu1 %v7409_v54  ;;  %v4745_v5 = vadd.f32 %v6486_v61, %v8578_v22  ;;  %v428_v22 = vpack.c.bf16 %v222_v17, %v222_v17  ;;  %v7447_v61 = vld [vmem:[%s9322_s1 + $0xa38] sm:$0xff]   ;;  %v7450_v3 = vld [vmem:[%s9322_s1 + $0xb40] sm:$0xff]   ;;  %v7457_v17 = vld [vmem:[%s9322_s1 + $0xb88] sm:$0xff]  }
 0x13b   :  { %v7448_v0 = vld [vmem:[%s9322_s1 + $0xab8] sm:$0xff]  }
 0x13c   :  { %v8678_v10 = vadd.f32 %v6508_v62, %v4745_v5  ;;  %6789 = vmatpush3.bf16.msra.mxu0 %v7410_v57  ;;  %5342 = vmatprep.mubr.bf16.mxu1 %v428_v22  ;;  %v7446_v57 = vld [vmem:[%s9322_s1 + $0xaf8] sm:$0xff]   ;;  %v31_v62 = vld [vmem:[%s9321_s0 + $0x50] sm:$0xff] }
 0x13d   :  { %6811 = vmatpush3.bf16.msra.mxu1 %v7411_v58  ;;  %6790 = vmatprep.subr.bf16.mxu0 %v7412_v1  ;;  %v230_v1 = vrot.slane %v31_v62, %v7769_v41  ;;  %v7462_v22 = vld [vmem:[%s9322_s1 + $0xb58] sm:$0xff]  }
 0x13e   :  { %6812 = vmatprep.subr.bf16.mxu1 %v7413_v2  ;;  %v223_v2 = vcombine.high %v31_v62, %v31_v62 }
 0x13f   :  { %v238_v4 = vcombine.high %v230_v1, %v230_v1 }
 0x140   :  { %6791 = vmatpush3.bf16.msra.mxu0 %v7414_v7  ;;  %v237_v5 = vrot.slane %v223_v2, %v7769_v41  ;;  %v429_v7 = vpack.c.bf16 %v230_v1, %v230_v1  ;;  %v7485_v1 = vld [vmem:[%s9322_s1 + $0xc00] sm:$0xff]  }
 0x141   :  { %6813 = vmatpush3.bf16.msra.mxu1 %v7415_v11  ;;  %6820 = vmatprep.subr.bf16.mxu0 %v7417_v14  ;;  %v430_v9 = vpack.c.bf16 %v238_v4, %v238_v4  ;;  %v7453_v11 = vld [vmem:[%s9322_s1 + $0xb80] sm:$0xff]  }
 0x142   :  { %6842 = vmatprep.subr.bf16.mxu1 %v7418_v15  ;;  %v431_v12 = vpack.c.bf16 %v237_v5, %v237_v5  ;;  %v7455_v15 = vld [vmem:[%s9322_s1 + $0xbc8] sm:$0xff]  }
 0x143   :  { %5303 = vmatmul.mubr.bf16.vlgmr.msra.gmra.mrb[36].mxu0 %v425_v18  ;;  %v7458_v18 = vld [vmem:[%s9322_s1 + $0xb50] sm:$0xff]  }
 0x144   :  { %5343 = vmatmul.mubr.bf16.vlgmr.msra.gmra.mrb[36].mxu1 %v427_v20  ;;  %6821 = vmatpush3.bf16.msra.mxu0 %v7419_v19  ;;  %v7459_v19 = vld [vmem:[%s9322_s1 + $0xbd0] sm:$0xff]  }
 0x145   :  { %6843 = vmatpush3.bf16.msra.mxu1 %v7420_v21  ;;  %6822 = vmatprep.subr.bf16.mxu0 %v7421_v23  ;;  %v7460_v20 = vld [vmem:[%s9322_s1 + $0xb10] sm:$0xff]   ;;  %v7463_v23 = vld [vmem:[%s9322_s1 + $0xbd8] sm:$0xff]  }
 0x146   :  { %6844 = vmatprep.subr.bf16.mxu1 %v7422_v24  ;;  %5382 = vmatprep.mubr.bf16.mxu0 %v430_v9  ;;  %v7461_v21 = vld [vmem:[%s9322_s1 + $0xb90] sm:$0xff]   ;;  %v7464_v24 = vld [vmem:[%s9322_s1 + $0xb18] sm:$0xff]   ;;  %v7490_v9 = vld [vmem:[%s9322_s1 + $0xc88] sm:$0xff]  }
 0x148   :  { %6823 = vmatpush3.bf16.msra.mxu0 %v7423_v25  ;;  %v7465_v25 = vld [vmem:[%s9322_s1 + $0xb98] sm:$0xff]  }
 0x149   :  { %6845 = vmatpush3.bf16.msra.mxu1 %v7424_v26  ;;  %6824 = vmatprep.subr.bf16.mxu0 %v7425_v27  ;;  %v7466_v26 = vld [vmem:[%s9322_s1 + $0xb60] sm:$0xff]  }
 0x14a   :  { %6846 = vmatprep.subr.bf16.mxu1 %v7426_v28  ;;  %v7467_v27 = vld [vmem:[%s9322_s1 + $0xbe0] sm:$0xff]  }
 0x14b   :  { %v7468_v28 = vld [vmem:[%s9322_s1 + $0xb20] sm:$0xff]  }
 0x14c   :  { %6825 = vmatpush3.bf16.msra.mxu0 %v7427_v29  ;;  %v7469_v29 = vld [vmem:[%s9322_s1 + $0xba0] sm:$0xff]  }
 0x14d   :  { %6847 = vmatpush3.bf16.msra.mxu1 %v7428_v30  ;;  %6826 = vmatprep.subr.bf16.mxu0 %v7429_v31  ;;  %v7470_v30 = vld [vmem:[%s9322_s1 + $0xb68] sm:$0xff]  }
 0x14e   :  { %6848 = vmatprep.subr.bf16.mxu1 %v7430_v32  ;;  %v7471_v31 = vld [vmem:[%s9322_s1 + $0xbe8] sm:$0xff]  }
 0x14f   :  { %v7472_v32 = vld [vmem:[%s9322_s1 + $0xb28] sm:$0xff]  }
 0x150   :  { %6827 = vmatpush3.bf16.msra.mxu0 %v7431_v33  ;;  %v7473_v33 = vld [vmem:[%s9322_s1 + $0xba8] sm:$0xff]  }
 0x151   :  { %6849 = vmatpush3.bf16.msra.mxu1 %v7432_v34  ;;  %6828 = vmatprep.subr.bf16.mxu0 %v7433_v35  ;;  %v7474_v34 = vld [vmem:[%s9322_s1 + $0xb70] sm:$0xff]  }
 0x152   :  { %6850 = vmatprep.subr.bf16.mxu1 %v7434_v36 }
 0x154   :  { %6829 = vmatpush3.bf16.msra.mxu0 %v7435_v37  ;;  %v7475_v37 = vld [vmem:[%s9322_s1 + $0xbf0] sm:$0xff]  }
 0x155   :  { %6851 = vmatpush3.bf16.msra.mxu1 %v7436_v38  ;;  %6830 = vmatprep.subr.bf16.mxu0 %v7437_v39  ;;  %v7476_v38 = vld [vmem:[%s9322_s1 + $0xb30] sm:$0xff]  }
 0x156   :  { %v6528_v45 = vpop.f32.mrb[12].mxu0  ;;  %6852 = vmatprep.subr.bf16.mxu1 %v7438_v40 }
 0x157   :  { %v6550_v46 = vpop.f32.mrb[12].mxu1  ;;  %v6529_v49 = vpop.f32.mrb[13].mxu0 }
 0x158   :  { %v6551_v50 = vpop.f32.mrb[13].mxu1  ;;  %v6530_v52 = vadd.f32 %v6529_v49, %v6528_v45  ;;  %v6531_v54 = vpop.f32.mrb[14].mxu0  ;;  %6831 = vmatpush3.bf16.msra.mxu0 %v7439_v42 }
 0x159   :  { %v6552_v53 = vadd.f32 %v6551_v50, %v6550_v46  ;;  %v6553_v55 = vpop.f32.mrb[14].mxu1  ;;  %6853 = vmatpush3.bf16.msra.mxu1 %v7440_v43  ;;  %v6532_v58 = vpop.f32.mrb[15].mxu0  ;;  %6832 = vmatprep.subr.bf16.mxu0 %v7441_v44  ;;  %v7477_v46 = vld [vmem:[%s9322_s1 + $0xbb0] sm:$0xff]   ;;  %v32_v54 = vld [vmem:[%s9321_s0 + $0x58] sm:$0xff] }
 0x15a   :  { %v6554_v59 = vpop.f32.mrb[15].mxu1  ;;  %v4825_v60 = vadd.f32 %v6530_v52, %v8678_v10  ;;  %6854 = vmatprep.subr.bf16.mxu1 %v7442_v47  ;;  %v239_v10 = vcombine.high %v237_v5, %v237_v5  ;;  %v7478_v47 = vld [vmem:[%s9322_s1 + $0xb78] sm:$0xff]   ;;  %v247_v55 = vrot.slane %v32_v54, %v7769_v41  ;;  %v7486_v5 = vld [vmem:[%s9322_s1 + $0xc80] sm:$0xff]  }
 0x15b   :  { %v7480_v52 = vld [vmem:[%s9322_s1 + $0xb38] sm:$0xff]  }
 0x15c   :  { %v8781_v63 = vadd.f32 %v6552_v53, %v4825_v60  ;;  %6833 = vmatpush3.bf16.msra.mxu0 %v7443_v48  ;;  %v432_v14 = vpack.c.bf16 %v239_v10, %v239_v10  ;;  %v7481_v58 = vld [vmem:[%s9322_s1 + $0xbb8] sm:$0xff]   ;;  %v255_v59 = vcombine.high %v247_v55, %v247_v55  ;;  %v433_v62 = vpack.c.bf16 %v247_v55, %v247_v55  ;;  %v7492_v10 = vld [vmem:[%s9322_s1 + $0xcd0] sm:$0xff]  }
 0x15d   :  { %6855 = vmatpush3.bf16.msra.mxu1 %v7444_v51  ;;  %6834 = vmatprep.subr.bf16.mxu0 %v7445_v56  ;;  %v7479_v51 = vld [vmem:[%s9322_s1 + $0xbf8] sm:$0xff]   ;;  %v240_v56 = vcombine.high %v32_v54, %v32_v54  ;;  %v7518_v54 = vld [vmem:[%s9322_s1 + $0xd00] sm:$0xff]  }
 0x15e   :  { %6856 = vmatprep.subr.bf16.mxu1 %v7446_v57  ;;  %5422 = vmatprep.mubr.bf16.mxu1 %v432_v14  ;;  %v7483_v57 = vld [vmem:[%s9322_s1 + $0xc40] sm:$0xff]   ;;  %v7496_v14 = vld [vmem:[%s9322_s1 + $0xcd8] sm:$0xff]  }
 0x15f   :  { %v254_v60 = vrot.slane %v240_v56, %v7769_v41 }
 0x160   :  { %6835 = vmatpush3.bf16.msra.mxu0 %v7447_v61  ;;  %v7484_v61 = vld [vmem:[%s9322_s1 + $0xcc0] sm:$0xff]  }
 0x161   :  { %6857 = vmatpush3.bf16.msra.mxu1 %v7448_v0  ;;  %6864 = vmatprep.subr.bf16.mxu0 %v7450_v3  ;;  %v256_v0 = vcombine.high %v254_v60, %v254_v60  ;;  %v435_v2 = vpack.c.bf16 %v254_v60, %v254_v60  ;;  %v7487_v3 = vld [vmem:[%s9322_s1 + $0xc48] sm:$0xff]  }
 0x162   :  { %6886 = vmatprep.subr.bf16.mxu1 %v7451_v6  ;;  %v7488_v6 = vld [vmem:[%s9322_s1 + $0xcc8] sm:$0xff]  }
 0x163   :  { %5383 = vmatmul.mubr.bf16.vlgmr.msra.gmra.mrb[40].mxu0 %v429_v7  ;;  %v436_v4 = vpack.c.bf16 %v256_v0, %v256_v0  ;;  %v7489_v7 = vld [vmem:[%s9322_s1 + $0xc08] sm:$0xff]   ;;  %v7524_v0 = vld [vmem:[%s9322_s1 + $0xd50] sm:$0xff]  }
 0x164   :  { %6865 = vmatpush3.bf16.msra.mxu0 %v7452_v8  ;;  %5423 = vmatmul.mubr.bf16.vlgmr.msra.gmra.mrb[40].mxu1 %v431_v12  ;;  %v7491_v8 = vld [vmem:[%s9322_s1 + $0xc50] sm:$0xff]   ;;  %v7495_v12 = vld [vmem:[%s9322_s1 + $0xc58] sm:$0xff]  }
 0x165   :  { %6866 = vmatprep.subr.bf16.mxu0 %v7454_v13  ;;  %6887 = vmatpush3.bf16.msra.mxu1 %v7453_v11  ;;  %v7493_v11 = vld [vmem:[%s9322_s1 + $0xc10] sm:$0xff]  }
 0x166   :  { %6888 = vmatprep.subr.bf16.mxu1 %v7455_v15  ;;  %5502 = vmatprep.mubr.bf16.mxu1 %v436_v4  ;;  %v7494_v13 = vld [vmem:[%s9322_s1 + $0xc90] sm:$0xff]   ;;  %v7497_v15 = vld [vmem:[%s9322_s1 + $0xc18] sm:$0xff]  }
 0x167   :  { %v7528_v4 = vld [vmem:[%s9322_s1 + $0xd58] sm:$0xff]  }
 0x168   :  { %6867 = vmatpush3.bf16.msra.mxu0 %v7456_v16  ;;  %v7499_v16 = vld [vmem:[%s9322_s1 + $0xc60] sm:$0xff]  }
 0x169   :  { %6868 = vmatprep.subr.bf16.mxu0 %v7458_v18  ;;  %6889 = vmatpush3.bf16.msra.mxu1 %v7457_v17  ;;  %v7498_v17 = vld [vmem:[%s9322_s1 + $0xc98] sm:$0xff]   ;;  %v7500_v18 = vld [vmem:[%s9322_s1 + $0xce0] sm:$0xff]  }
 0x16a   :  { %6890 = vmatprep.subr.bf16.mxu1 %v7459_v19  ;;  %v7501_v19 = vld [vmem:[%s9322_s1 + $0xc20] sm:$0xff]  }
 0x16c   :  { %6869 = vmatpush3.bf16.msra.mxu0 %v7460_v20  ;;  %v7503_v20 = vld [vmem:[%s9322_s1 + $0xc68] sm:$0xff]  }
 0x16d   :  { %6870 = vmatprep.subr.bf16.mxu0 %v7462_v22  ;;  %6891 = vmatpush3.bf16.msra.mxu1 %v7461_v21  ;;  %v7502_v21 = vld [vmem:[%s9322_s1 + $0xca0] sm:$0xff]   ;;  %v7504_v22 = vld [vmem:[%s9322_s1 + $0xce8] sm:$0xff]  }
 0x16e   :  { %6892 = vmatprep.subr.bf16.mxu1 %v7463_v23  ;;  %v7505_v23 = vld [vmem:[%s9322_s1 + $0xc28] sm:$0xff]  }
 0x170   :  { %6871 = vmatpush3.bf16.msra.mxu0 %v7464_v24 }
 0x171   :  { %6872 = vmatprep.subr.bf16.mxu0 %v7466_v26  ;;  %6893 = vmatpush3.bf16.msra.mxu1 %v7465_v25  ;;  %v7506_v26 = vld [vmem:[%s9322_s1 + $0xca8] sm:$0xff]  }
 0x172   :  { %6894 = vmatprep.subr.bf16.mxu1 %v7467_v27  ;;  %v7507_v27 = vld [vmem:[%s9322_s1 + $0xc70] sm:$0xff]  }
 0x174   :  { %6873 = vmatpush3.bf16.msra.mxu0 %v7468_v28 }
 0x175   :  { %6874 = vmatprep.subr.bf16.mxu0 %v7470_v30  ;;  %6895 = vmatpush3.bf16.msra.mxu1 %v7469_v29 }
 0x176   :  { %v6572_v35 = vpop.f32.mrb[16].mxu0  ;;  %6896 = vmatprep.subr.bf16.mxu1 %v7471_v31 }
 0x177   :  { %v6594_v36 = vpop.f32.mrb[16].mxu1  ;;  %v6573_v39 = vpop.f32.mrb[17].mxu0 }
 0x178   :  { %v6595_v40 = vpop.f32.mrb[17].mxu1  ;;  %v6574_v42 = vadd.f32 %v6573_v39, %v6572_v35  ;;  %v6575_v44 = vpop.f32.mrb[18].mxu0  ;;  %6875 = vmatpush3.bf16.msra.mxu0 %v7472_v32  ;;  %v7509_v35 = vld [vmem:[%s9322_s1 + $0xc30] sm:$0xff]  }
 0x179   :  { %v6596_v43 = vadd.f32 %v6595_v40, %v6594_v36  ;;  %v6597_v45 = vpop.f32.mrb[18].mxu1  ;;  %v6576_v48 = vpop.f32.mrb[19].mxu0  ;;  %6876 = vmatprep.subr.bf16.mxu0 %v7474_v34  ;;  %6897 = vmatpush3.bf16.msra.mxu1 %v7473_v33  ;;  %v7508_v34 = vld [vmem:[%s9322_s1 + $0xcf0] sm:$0xff]   ;;  %v7511_v40 = vld [vmem:[%s9322_s1 + $0xc78] sm:$0xff]  }
 0x17a   :  { %v6598_v49 = vpop.f32.mrb[19].mxu1  ;;  %v4905_v50 = vadd.f32 %v6574_v42, %v8781_v63  ;;  %6898 = vmatprep.subr.bf16.mxu1 %v7475_v37  ;;  %v434_v63 = vpack.c.bf16 %v255_v59, %v255_v59  ;;  %v7512_v42 = vld [vmem:[%s9322_s1 + $0xcf8] sm:$0xff]   ;;  %v33_v45 = vld [vmem:[%s9321_s0 + $0x60] sm:$0xff]  ;;  %v7520_v59 = vld [vmem:[%s9322_s1 + $0xd48] sm:$0xff]  }
 0x17b   :  { %v7513_v44 = vld [vmem:[%s9322_s1 + $0xc38] sm:$0xff]   ;;  %v7516_v48 = vld [vmem:[%s9322_s1 + $0xd40] sm:$0xff]  }
 0x17c   :  { %v8882_v53 = vadd.f32 %v6596_v43, %v4905_v50  ;;  %6877 = vmatpush3.bf16.msra.mxu0 %v7476_v38  ;;  %5462 = vmatprep.mubr.bf16.mxu0 %v434_v63  ;;  %v7510_v38 = vld [vmem:[%s9322_s1 + $0xcb0] sm:$0xff]   ;;  %v7514_v49 = vld [vmem:[%s9322_s1 + $0xcb8] sm:$0xff]   ;;  %v7523_v63 = vld [vmem:[%s9322_s1 + $0xd88] sm:$0xff]  }
 0x17d   :  { %6878 = vmatprep.subr.bf16.mxu0 %v7478_v47  ;;  %6899 = vmatpush3.bf16.msra.mxu1 %v7477_v46  ;;  %v264_v46 = vrot.slane %v33_v45, %v7769_v41  ;;  %v257_v47 = vcombine.high %v33_v45, %v33_v45 }
 0x17e   :  { %6900 = vmatprep.subr.bf16.mxu1 %v7479_v51 }
 0x17f   :  { %v272_v50 = vcombine.high %v264_v46, %v264_v46  ;;  %v271_v51 = vrot.slane %v257_v47, %v7769_v41  ;;  %v7551_v47 = vld [vmem:[%s9322_s1 + $0xe00] sm:$0xff]  }
 0x180   :  { %6879 = vmatpush3.bf16.msra.mxu0 %v7480_v52  ;;  %v7517_v52 = vld [vmem:[%s9322_s1 + $0xdc0] sm:$0xff]  }
 0x181   :  { %6908 = vmatprep.subr.bf16.mxu0 %v7483_v57  ;;  %6901 = vmatpush3.bf16.msra.mxu1 %v7481_v58  ;;  %v438_v55 = vpack.c.bf16 %v272_v50, %v272_v50  ;;  %v273_v56 = vcombine.high %v271_v51, %v271_v51  ;;  %v7519_v57 = vld [vmem:[%s9322_s1 + $0xd80] sm:$0xff]   ;;  %v439_v58 = vpack.c.bf16 %v271_v51, %v271_v51 }
 0x182   :  { %6930 = vmatprep.subr.bf16.mxu1 %v7484_v61  ;;  %v7521_v61 = vld [vmem:[%s9322_s1 + $0xdc8] sm:$0xff]   ;;  %v7552_v51 = vld [vmem:[%s9322_s1 + $0xe80] sm:$0xff]  }
 0x183   :  { %5463 = vmatmul.mubr.bf16.vlgmr.msra.gmra.mrb[44].mxu0 %v433_v62  ;;  %v440_v60 = vpack.c.bf16 %v273_v56, %v273_v56  ;;  %v7522_v62 = vld [vmem:[%s9322_s1 + $0xd08] sm:$0xff]   ;;  %v7558_v56 = vld [vmem:[%s9322_s1 + $0xed0] sm:$0xff]  }
 0x184   :  { %6909 = vmatpush3.bf16.msra.mxu0 %v7485_v1  ;;  %5503 = vmatmul.mubr.bf16.vlgmr.msra.gmra.mrb[44].mxu1 %v435_v2  ;;  %v7525_v1 = vld [vmem:[%s9322_s1 + $0xdd0] sm:$0xff]  }
 0x185   :  { %6910 = vmatprep.subr.bf16.mxu0 %v7487_v3  ;;  %6931 = vmatpush3.bf16.msra.mxu1 %v7486_v5  ;;  %v7526_v2 = vld [vmem:[%s9322_s1 + $0xd10] sm:$0xff]   ;;  %v7529_v5 = vld [vmem:[%s9322_s1 + $0xdd8] sm:$0xff]  }
 0x186   :  { %6932 = vmatprep.subr.bf16.mxu1 %v7488_v6  ;;  %5542 = vmatprep.mubr.bf16.mxu0 %v438_v55  ;;  %v7527_v3 = vld [vmem:[%s9322_s1 + $0xd90] sm:$0xff]   ;;  %v7530_v6 = vld [vmem:[%s9322_s1 + $0xd18] sm:$0xff]   ;;  %v7556_v55 = vld [vmem:[%s9322_s1 + $0xe88] sm:$0xff]  }
 0x187   :  { %5582 = vmatprep.mubr.bf16.mxu1 %v440_v60  ;;  %v7562_v60 = vld [vmem:[%s9322_s1 + $0xed8] sm:$0xff]  }
 0x188   :  { %6911 = vmatpush3.bf16.msra.mxu0 %v7489_v7  ;;  %v7531_v7 = vld [vmem:[%s9322_s1 + $0xd98] sm:$0xff]  }
 0x189   :  { %6912 = vmatprep.subr.bf16.mxu0 %v7491_v8  ;;  %6933 = vmatpush3.bf16.msra.mxu1 %v7490_v9  ;;  %v7532_v8 = vld [vmem:[%s9322_s1 + $0xd60] sm:$0xff]  }
 0x18a   :  { %6934 = vmatprep.subr.bf16.mxu1 %v7492_v10  ;;  %v7533_v9 = vld [vmem:[%s9322_s1 + $0xde0] sm:$0xff]  }
 0x18b   :  { %v7534_v10 = vld [vmem:[%s9322_s1 + $0xd20] sm:$0xff]  }
 0x18c   :  { %6913 = vmatpush3.bf16.msra.mxu0 %v7493_v11  ;;  %v7535_v11 = vld [vmem:[%s9322_s1 + $0xda0] sm:$0xff]  }
 0x18d   :  { %6914 = vmatprep.subr.bf16.mxu0 %v7495_v12  ;;  %6935 = vmatpush3.bf16.msra.mxu1 %v7494_v13  ;;  %v7536_v12 = vld [vmem:[%s9322_s1 + $0xd68] sm:$0xff]  }
 0x18e   :  { %6936 = vmatprep.subr.bf16.mxu1 %v7496_v14  ;;  %v7537_v13 = vld [vmem:[%s9322_s1 + $0xde8] sm:$0xff]  }
 0x18f   :  { %v7538_v14 = vld [vmem:[%s9322_s1 + $0xd28] sm:$0xff]  }
 0x190   :  { %6915 = vmatpush3.bf16.msra.mxu0 %v7497_v15 }
 0x191   :  { %6916 = vmatprep.subr.bf16.mxu0 %v7499_v16  ;;  %6937 = vmatpush3.bf16.msra.mxu1 %v7498_v17  ;;  %v7539_v17 = vld [vmem:[%s9322_s1 + $0xda8] sm:$0xff]  }
 0x192   :  { %6938 = vmatprep.subr.bf16.mxu1 %v7500_v18  ;;  %v7540_v18 = vld [vmem:[%s9322_s1 + $0xd70] sm:$0xff]  }
 0x194   :  { %6917 = vmatpush3.bf16.msra.mxu0 %v7501_v19 }
 0x195   :  { %6918 = vmatprep.subr.bf16.mxu0 %v7503_v20  ;;  %6939 = vmatpush3.bf16.msra.mxu1 %v7502_v21 }
 0x196   :  { %v6616_v24 = vpop.f32.mrb[20].mxu0  ;;  %6940 = vmatprep.subr.bf16.mxu1 %v7504_v22 }
 0x197   :  { %v6638_v25 = vpop.f32.mrb[20].mxu1  ;;  %v6617_v28 = vpop.f32.mrb[21].mxu0 }
 0x198   :  { %v6639_v29 = vpop.f32.mrb[21].mxu1  ;;  %v6618_v30 = vadd.f32 %v6617_v28, %v6616_v24  ;;  %v6619_v32 = vpop.f32.mrb[22].mxu0  ;;  %6919 = vmatpush3.bf16.msra.mxu0 %v7505_v23 }
 0x199   :  { %v6640_v31 = vadd.f32 %v6639_v29, %v6638_v25  ;;  %v6641_v33 = vpop.f32.mrb[22].mxu1  ;;  %v6620_v36 = vpop.f32.mrb[23].mxu0  ;;  %6920 = vmatprep.subr.bf16.mxu0 %v7507_v27  ;;  %6941 = vmatpush3.bf16.msra.mxu1 %v7506_v26  ;;  %v7541_v25 = vld [vmem:[%s9322_s1 + $0xdf0] sm:$0xff]  }
 0x19a   :  { %v6642_v37 = vpop.f32.mrb[23].mxu1  ;;  %v4985_v39 = vadd.f32 %v6618_v30, %v8882_v53  ;;  %6942 = vmatprep.subr.bf16.mxu1 %v7508_v34  ;;  %v437_v53 = vpack.c.bf16 %v264_v46, %v264_v46  ;;  %v7542_v26 = vld [vmem:[%s9322_s1 + $0xd30] sm:$0xff]   ;;  %v7545_v33 = vld [vmem:[%s9322_s1 + $0xdf8] sm:$0xff]  }
 0x19b   :  { %v7543_v30 = vld [vmem:[%s9322_s1 + $0xdb0] sm:$0xff]   ;;  %v7546_v34 = vld [vmem:[%s9322_s1 + $0xd38] sm:$0xff]  }
 0x19c   :  { %v8983_v43 = vadd.f32 %v6640_v31, %v4985_v39  ;;  %6921 = vmatpush3.bf16.msra.mxu0 %v7509_v35  ;;  %v7544_v31 = vld [vmem:[%s9322_s1 + $0xd78] sm:$0xff]   ;;  %v34_v35 = vld [vmem:[%s9321_s0 + $0x68] sm:$0xff] }
 0x19d   :  { %6922 = vmatprep.subr.bf16.mxu0 %v7511_v40  ;;  %6943 = vmatpush3.bf16.msra.mxu1 %v7510_v38  ;;  %v281_v36 = vrot.slane %v34_v35, %v7769_v41  ;;  %v274_v37 = vcombine.high %v34_v35, %v34_v35  ;;  %v7549_v38 = vld [vmem:[%s9322_s1 + $0xe40] sm:$0xff]   ;;  %v7547_v39 = vld [vmem:[%s9322_s1 + $0xdb8] sm:$0xff]  }
 0x19e   :  { %6944 = vmatprep.subr.bf16.mxu1 %v7512_v42 }
 0x19f   :  { %v289_v40 = vcombine.high %v281_v36, %v281_v36  ;;  %v288_v42 = vrot.slane %v274_v37, %v7769_v41  ;;  %v7584_v37 = vld [vmem:[%s9322_s1 + $0xf00] sm:$0xff]  }
 0x1a0   :  { %6923 = vmatpush3.bf16.msra.mxu0 %v7513_v44  ;;  %v441_v44 = vpack.c.bf16 %v281_v36, %v281_v36 }
 0x1a1   :  { %6952 = vmatprep.subr.bf16.mxu0 %v7516_v48  ;;  %6945 = vmatpush3.bf16.msra.mxu1 %v7514_v49  ;;  %v442_v45 = vpack.c.bf16 %v289_v40, %v289_v40  ;;  %v290_v46 = vcombine.high %v288_v42, %v288_v42  ;;  %v443_v48 = vpack.c.bf16 %v288_v42, %v288_v42  ;;  %v7553_v49 = vld [vmem:[%s9322_s1 + $0xe48] sm:$0xff]   ;;  %v7585_v42 = vld [vmem:[%s9322_s1 + $0xf80] sm:$0xff]  }
 0x1a2   :  { %6974 = vmatprep.subr.bf16.mxu1 %v7517_v52  ;;  %v7554_v52 = vld [vmem:[%s9322_s1 + $0xec8] sm:$0xff]  }
 0x1a3   :  { %5543 = vmatmul.mubr.bf16.vlgmr.msra.gmra.mrb[48].mxu0 %v437_v53  ;;  %v444_v50 = vpack.c.bf16 %v290_v46, %v290_v46  ;;  %v7555_v53 = vld [vmem:[%s9322_s1 + $0xe08] sm:$0xff]  }
 0x1a4   :  { %6953 = vmatpush3.bf16.msra.mxu0 %v7518_v54  ;;  %5583 = vmatmul.mubr.bf16.vlgmr.msra.gmra.mrb[48].mxu1 %v439_v58  ;;  %v7557_v54 = vld [vmem:[%s9322_s1 + $0xe50] sm:$0xff]   ;;  %v7561_v58 = vld [vmem:[%s9322_s1 + $0xe58] sm:$0xff]   ;;  %v7589_v46 = vld [vmem:[%s9322_s1 + $0xf88] sm:$0xff]  }
 0x1a5   :  { %6954 = vmatprep.subr.bf16.mxu0 %v7520_v59  ;;  %6975 = vmatpush3.bf16.msra.mxu1 %v7519_v57  ;;  %v7559_v57 = vld [vmem:[%s9322_s1 + $0xe10] sm:$0xff]  }
 0x1a6   :  { %6976 = vmatprep.subr.bf16.mxu1 %v7521_v61  ;;  %5622 = vmatprep.mubr.bf16.mxu0 %v442_v45  ;;  %v7560_v59 = vld [vmem:[%s9322_s1 + $0xe90] sm:$0xff]   ;;  %v7563_v61 = vld [vmem:[%s9322_s1 + $0xe18] sm:$0xff]  }
 0x1a7   :  { %5662 = vmatprep.mubr.bf16.mxu1 %v444_v50  ;;  %v7590_v45 = vld [vmem:[%s9322_s1 + $0xf50] sm:$0xff]  }
 0x1a8   :  { %6955 = vmatpush3.bf16.msra.mxu0 %v7522_v62  ;;  %v7565_v62 = vld [vmem:[%s9322_s1 + $0xe60] sm:$0xff]   ;;  %v7593_v50 = vld [vmem:[%s9322_s1 + $0xf90] sm:$0xff]  }
 0x1a9   :  { %6956 = vmatprep.subr.bf16.mxu0 %v7524_v0  ;;  %6977 = vmatpush3.bf16.msra.mxu1 %v7523_v63  ;;  %v7564_v63 = vld [vmem:[%s9322_s1 + $0xe98] sm:$0xff]   ;;  %v7566_v0 = vld [vmem:[%s9322_s1 + $0xee0] sm:$0xff]  }
 0x1aa   :  { %6978 = vmatprep.subr.bf16.mxu1 %v7525_v1  ;;  %v7567_v1 = vld [vmem:[%s9322_s1 + $0xe20] sm:$0xff]  }
 0x1ac   :  { %6957 = vmatpush3.bf16.msra.mxu0 %v7526_v2  ;;  %v7569_v2 = vld [vmem:[%s9322_s1 + $0xe68] sm:$0xff]  }
 0x1ad   :  { %6958 = vmatprep.subr.bf16.mxu0 %v7528_v4  ;;  %6979 = vmatpush3.bf16.msra.mxu1 %v7527_v3  ;;  %v7568_v3 = vld [vmem:[%s9322_s1 + $0xea0] sm:$0xff]  }
 0x1ae   :  { %6980 = vmatprep.subr.bf16.mxu1 %v7529_v5 }
 0x1b0   :  { %6959 = vmatpush3.bf16.msra.mxu0 %v7530_v6  ;;  %v7570_v6 = vld [vmem:[%s9322_s1 + $0xee8] sm:$0xff]  }
 0x1b1   :  { %6960 = vmatprep.subr.bf16.mxu0 %v7532_v8  ;;  %6981 = vmatpush3.bf16.msra.mxu1 %v7531_v7  ;;  %v7571_v7 = vld [vmem:[%s9322_s1 + $0xe28] sm:$0xff]  }
 0x1b2   :  { %6982 = vmatprep.subr.bf16.mxu1 %v7533_v9 }
 0x1b4   :  { %6961 = vmatpush3.bf16.msra.mxu0 %v7534_v10  ;;  %v7572_v10 = vld [vmem:[%s9322_s1 + $0xea8] sm:$0xff]  }
 0x1b5   :  { %6962 = vmatprep.subr.bf16.mxu0 %v7536_v12  ;;  %6983 = vmatpush3.bf16.msra.mxu1 %v7535_v11 }
 0x1b6   :  { %v6660_v15 = vpop.f32.mrb[24].mxu0  ;;  %6984 = vmatprep.subr.bf16.mxu1 %v7537_v13 }
 0x1b7   :  { %v6682_v16 = vpop.f32.mrb[24].mxu1  ;;  %v6661_v19 = vpop.f32.mrb[25].mxu0 }
 0x1b8   :  { %v6683_v20 = vpop.f32.mrb[25].mxu1  ;;  %v6662_v21 = vadd.f32 %v6661_v19, %v6660_v15  ;;  %v6663_v23 = vpop.f32.mrb[26].mxu0  ;;  %6963 = vmatpush3.bf16.msra.mxu0 %v7538_v14  ;;  %v7573_v15 = vld [vmem:[%s9322_s1 + $0xe70] sm:$0xff]  }
 0x1b9   :  { %v6684_v22 = vadd.f32 %v6683_v20, %v6682_v16  ;;  %v6685_v24 = vpop.f32.mrb[26].mxu1  ;;  %v6664_v27 = vpop.f32.mrb[27].mxu0  ;;  %6964 = vmatprep.subr.bf16.mxu0 %v7540_v18  ;;  %6985 = vmatpush3.bf16.msra.mxu1 %v7539_v17  ;;  %v7574_v16 = vld [vmem:[%s9322_s1 + $0xef0] sm:$0xff]   ;;  %v7577_v23 = vld [vmem:[%s9322_s1 + $0xe78] sm:$0xff]  }
 0x1ba   :  { %v6686_v28 = vpop.f32.mrb[27].mxu1  ;;  %v5065_v29 = vadd.f32 %v6662_v21, %v8983_v43  ;;  %6986 = vmatprep.subr.bf16.mxu1 %v7541_v25  ;;  %v7550_v43 = vld [vmem:[%s9322_s1 + $0xec0] sm:$0xff]   ;;  %v7575_v20 = vld [vmem:[%s9322_s1 + $0xe30] sm:$0xff]   ;;  %v7578_v24 = vld [vmem:[%s9322_s1 + $0xef8] sm:$0xff]  }
 0x1bb   :  { %v7576_v21 = vld [vmem:[%s9322_s1 + $0xeb0] sm:$0xff]   ;;  %v7579_v25 = vld [vmem:[%s9322_s1 + $0xe38] sm:$0xff]  }
 0x1bc   :  { %v9084_v32 = vadd.f32 %v6684_v22, %v5065_v29  ;;  %6965 = vmatpush3.bf16.msra.mxu0 %v7542_v26  ;;  %v35_v26 = vld [vmem:[%s9321_s0 + $0x70] sm:$0xff]  ;;  %v7582_v29 = vld [vmem:[%s9322_s1 + $0xf40] sm:$0xff]  }
 0x1bd   :  { %6966 = vmatprep.subr.bf16.mxu0 %v7544_v31  ;;  %6987 = vmatpush3.bf16.msra.mxu1 %v7543_v30  ;;  %v298_v27 = vrot.slane %v35_v26, %v7769_v41  ;;  %v291_v28 = vcombine.high %v35_v26, %v35_v26  ;;  %v7580_v30 = vld [vmem:[%s9322_s1 + $0xeb8] sm:$0xff]  }
 0x1be   :  { %6988 = vmatprep.subr.bf16.mxu1 %v7545_v33  ;;  %v7583_v33 = vld [vmem:[%s9322_s1 + $0xfc0] sm:$0xff]  }
 0x1bf   :  { %v306_v31 = vcombine.high %v298_v27, %v298_v27 }
 0x1c0   :  { %6967 = vmatpush3.bf16.msra.mxu0 %v7546_v34  ;;  %v445_v34 = vpack.c.bf16 %v298_v27, %v298_v27 }
 0x1c1   :  { %6996 = vmatprep.subr.bf16.mxu0 %v7549_v38  ;;  %6989 = vmatpush3.bf16.msra.mxu1 %v7547_v39  ;;  %v446_v35 = vpack.c.bf16 %v306_v31, %v306_v31  ;;  %v7586_v39 = vld [vmem:[%s9322_s1 + $0xf48] sm:$0xff]  }
 0x1c2   :  { %7018 = vmatprep.subr.bf16.mxu1 %v7550_v43  ;;  %v7587_v43 = vld [vmem:[%s9322_s1 + $0xfc8] sm:$0xff]  }
 0x1c3   :  { %5623 = vmatmul.mubr.bf16.vlgmr.msra.gmra.mrb[52].mxu0 %v441_v44  ;;  %v7588_v44 = vld [vmem:[%s9322_s1 + $0xf08] sm:$0xff]  }
 0x1c4   :  { %6997 = vmatpush3.bf16.msra.mxu0 %v7551_v47  ;;  %5663 = vmatmul.mubr.bf16.vlgmr.msra.gmra.mrb[52].mxu1 %v443_v48  ;;  %v7591_v47 = vld [vmem:[%s9322_s1 + $0xfd0] sm:$0xff]  }
 0x1c5   :  { %6998 = vmatprep.subr.bf16.mxu0 %v7553_v49  ;;  %7019 = vmatpush3.bf16.msra.mxu1 %v7552_v51  ;;  %v7592_v48 = vld [vmem:[%s9322_s1 + $0xf10] sm:$0xff]   ;;  %v7594_v49 = vld [vmem:[%s9322_s1 + $0xf58] sm:$0xff]  }
 0x1c6   :  { %7020 = vmatprep.subr.bf16.mxu1 %v7554_v52  ;;  %5702 = vmatprep.mubr.bf16.mxu0 %v446_v35  ;;  %v7595_v51 = vld [vmem:[%s9322_s1 + $0xfd8] sm:$0xff]  }
 0x1c7   :  { %v7596_v52 = vld [vmem:[%s9322_s1 + $0xf18] sm:$0xff]  }
 0x1c8   :  { %6999 = vmatpush3.bf16.msra.mxu0 %v7555_v53  ;;  %v7598_v53 = vld [vmem:[%s9322_s1 + $0xf60] sm:$0xff]  }
 0x1c9   :  { %7000 = vmatprep.subr.bf16.mxu0 %v7557_v54  ;;  %7021 = vmatpush3.bf16.msra.mxu1 %v7556_v55  ;;  %v7597_v54 = vld [vmem:[%s9322_s1 + $0xf98] sm:$0xff]   ;;  %v7599_v55 = vld [vmem:[%s9322_s1 + $0xfe0] sm:$0xff]  }
 0x1ca   :  { %7022 = vmatprep.subr.bf16.mxu1 %v7558_v56  ;;  %v7600_v56 = vld [vmem:[%s9322_s1 + $0xf20] sm:$0xff]  }
 0x1cc   :  { %7001 = vmatpush3.bf16.msra.mxu0 %v7559_v57  ;;  %v7602_v57 = vld [vmem:[%s9322_s1 + $0xf68] sm:$0xff]  }
 0x1cd   :  { %7002 = vmatprep.subr.bf16.mxu0 %v7561_v58  ;;  %7023 = vmatpush3.bf16.msra.mxu1 %v7560_v59  ;;  %v7601_v58 = vld [vmem:[%s9322_s1 + $0xfa0] sm:$0xff]  }
 0x1ce   :  { %7024 = vmatprep.subr.bf16.mxu1 %v7562_v60 }
 0x1d0   :  { %7003 = vmatpush3.bf16.msra.mxu0 %v7563_v61  ;;  %v7603_v61 = vld [vmem:[%s9322_s1 + $0xfe8] sm:$0xff]  }
 0x1d1   :  { %7004 = vmatprep.subr.bf16.mxu0 %v7565_v62  ;;  %7025 = vmatpush3.bf16.msra.mxu1 %v7564_v63 }
 0x1d2   :  { %7026 = vmatprep.subr.bf16.mxu1 %v7566_v0 }
 0x1d4   :  { %7005 = vmatpush3.bf16.msra.mxu0 %v7567_v1 }
 0x1d5   :  { %7006 = vmatprep.subr.bf16.mxu0 %v7569_v2  ;;  %7027 = vmatpush3.bf16.msra.mxu1 %v7568_v3 }
 0x1d6   :  { %v6704_v4 = vpop.f32.mrb[28].mxu0  ;;  %7028 = vmatprep.subr.bf16.mxu1 %v7570_v6 }
 0x1d7   :  { %v6726_v5 = vpop.f32.mrb[28].mxu1  ;;  %v6705_v8 = vpop.f32.mrb[29].mxu0 }
 0x1d8   :  { %v6727_v9 = vpop.f32.mrb[29].mxu1  ;;  %v6706_v11 = vadd.f32 %v6705_v8, %v6704_v4  ;;  %v6707_v13 = vpop.f32.mrb[30].mxu0  ;;  %7007 = vmatpush3.bf16.msra.mxu0 %v7571_v7  ;;  %v7604_v4 = vld [vmem:[%s9322_s1 + $0xf28] sm:$0xff]  }
 0x1d9   :  { %v6728_v12 = vadd.f32 %v6727_v9, %v6726_v5  ;;  %v6729_v14 = vpop.f32.mrb[30].mxu1  ;;  %v6708_v17 = vpop.f32.mrb[31].mxu0  ;;  %7008 = vmatprep.subr.bf16.mxu0 %v7573_v15  ;;  %7029 = vmatpush3.bf16.msra.mxu1 %v7572_v10  ;;  %v7606_v5 = vld [vmem:[%s9322_s1 + $0xf70] sm:$0xff]   ;;  %v7605_v9 = vld [vmem:[%s9322_s1 + $0xfa8] sm:$0xff]   ;;  %v7610_v13 = vld [vmem:[%s9322_s1 + $0xf78] sm:$0xff]  }
 0x1da   :  { %v6730_v18 = vpop.f32.mrb[31].mxu1  ;;  %v5145_v19 = vadd.f32 %v6706_v11, %v9084_v32  ;;  %7030 = vmatprep.subr.bf16.mxu1 %v7574_v16  ;;  %v305_v32 = vrot.slane %v291_v28, %v7769_v41  ;;  %v7607_v10 = vld [vmem:[%s9322_s1 + $0xff0] sm:$0xff]   ;;  %v7611_v15 = vld [vmem:[%s9322_s1 + $0xff8] sm:$0xff]  }
 0x1db   :  { %v7609_v14 = vld [vmem:[%s9322_s1 + $0xfb0] sm:$0xff]   ;;  %v7612_v16 = vld [vmem:[%s9322_s1 + $0xf38] sm:$0xff]  }
 0x1dc   :  { %v9185_v22 = vadd.f32 %v6728_v12, %v5145_v19  ;;  %7009 = vmatpush3.bf16.msra.mxu0 %v7575_v20  ;;  %v307_v36 = vcombine.high %v305_v32, %v305_v32  ;;  %v447_v38 = vpack.c.bf16 %v305_v32, %v305_v32  ;;  %v7608_v12 = vld [vmem:[%s9322_s1 + $0xf30] sm:$0xff]   ;;  %v36_v17 = vld [vmem:[%s9321_s0 + $0x78] sm:$0xff] }
 0x1dd   :  { %7010 = vmatprep.subr.bf16.mxu0 %v7577_v23  ;;  %7031 = vmatpush3.bf16.msra.mxu1 %v7576_v21 }
 0x1de   :  { %7032 = vmatprep.subr.bf16.mxu1 %v7578_v24  ;;  %v448_v40 = vpack.c.bf16 %v307_v36, %v307_v36 }
 0x1e0   :  { %7011 = vmatpush3.bf16.msra.mxu0 %v7579_v25  ;;  %5742 = vmatprep.mubr.bf16.mxu1 %v448_v40 }
 0x1e1   :  { %7040 = vmatprep.subr.bf16.mxu0 %v7582_v29  ;;  %7033 = vmatpush3.bf16.msra.mxu1 %v7580_v30 }
 0x1e2   :  { %7062 = vmatprep.subr.bf16.mxu1 %v7583_v33 }
 0x1e3   :  { %5703 = vmatmul.mubr.bf16.vlgmr.msra.gmra.mrb[56].mxu0 %v445_v34 }
 0x1e4   :  { %7041 = vmatpush3.bf16.msra.mxu0 %v7584_v37  ;;  %5743 = vmatmul.mubr.bf16.vlgmr.msra.gmra.mrb[56].mxu1 %v447_v38 }
 0x1e5   :  { %7042 = vmatprep.subr.bf16.mxu0 %v7586_v39  ;;  %7063 = vmatpush3.bf16.msra.mxu1 %v7585_v42 }
 0x1e6   :  { %7064 = vmatprep.subr.bf16.mxu1 %v7587_v43 }
 0x1e8   :  { %7043 = vmatpush3.bf16.msra.mxu0 %v7588_v44 }
 0x1e9   :  { %7044 = vmatprep.subr.bf16.mxu0 %v7590_v45  ;;  %7065 = vmatpush3.bf16.msra.mxu1 %v7589_v46 }
 0x1ea   :  { %7066 = vmatprep.subr.bf16.mxu1 %v7591_v47 }
 0x1ec   :  { %7045 = vmatpush3.bf16.msra.mxu0 %v7592_v48 }
 0x1ed   :  { %7046 = vmatprep.subr.bf16.mxu0 %v7594_v49  ;;  %7067 = vmatpush3.bf16.msra.mxu1 %v7593_v50 }
 0x1ee   :  { %7068 = vmatprep.subr.bf16.mxu1 %v7595_v51 }
 0x1f0   :  { %7047 = vmatpush3.bf16.msra.mxu0 %v7596_v52 }
 0x1f1   :  { %7048 = vmatprep.subr.bf16.mxu0 %v7598_v53  ;;  %7069 = vmatpush3.bf16.msra.mxu1 %v7597_v54 }
 0x1f2   :  { %7070 = vmatprep.subr.bf16.mxu1 %v7599_v55 }
 0x1f4   :  { %7049 = vmatpush3.bf16.msra.mxu0 %v7600_v56 }
 0x1f5   :  { %7050 = vmatprep.subr.bf16.mxu0 %v7602_v57  ;;  %7071 = vmatpush3.bf16.msra.mxu1 %v7601_v58 }
 0x1f6   :  { %v6748_v59 = vpop.f32.mrb[32].mxu0  ;;  %7072 = vmatprep.subr.bf16.mxu1 %v7603_v61 }
 0x1f7   :  { %v6770_v60 = vpop.f32.mrb[32].mxu1  ;;  %v6749_v62 = vpop.f32.mrb[33].mxu0 }
 0x1f8   :  { %v6771_v63 = vpop.f32.mrb[33].mxu1  ;;  %v6750_v0 = vadd.f32 %v6749_v62, %v6748_v59  ;;  %v6751_v2 = vpop.f32.mrb[34].mxu0  ;;  %7051 = vmatpush3.bf16.msra.mxu0 %v7604_v4 }
 0x1f9   :  { %v6772_v1 = vadd.f32 %v6771_v63, %v6770_v60  ;;  %v6773_v3 = vpop.f32.mrb[34].mxu1  ;;  %v6752_v6 = vpop.f32.mrb[35].mxu0  ;;  %7052 = vmatprep.subr.bf16.mxu0 %v7606_v5  ;;  %7073 = vmatpush3.bf16.msra.mxu1 %v7605_v9 }
 0x1fa   :  { %v6774_v7 = vpop.f32.mrb[35].mxu1  ;;  %v5225_v8 = vadd.f32 %v6750_v0, %v9185_v22  ;;  %7074 = vmatprep.subr.bf16.mxu1 %v7607_v10 }
 0x1fc   :  { %v5265_v11 = vadd.f32 %v6772_v1, %v5225_v8  ;;  %7053 = vmatpush3.bf16.msra.mxu0 %v7608_v12 }
 0x1fd   :  { %8 = vsyncpa [#allocation3], 0  ;;  %7054 = vmatprep.subr.bf16.mxu0 %v7610_v13  ;;  %v315_v18 = vrot.slane %v36_v17, %v7769_v41  ;;  %v308_v19 = vcombine.high %v36_v17, %v36_v17  ;;  %7075 = vmatpush3.bf16.msra.mxu1 %v7609_v14  ;;  %v7613_v20 = vld [vmem:[%s9322_s1 + $0xfb8] sm:$0xff]   ;;  %v7642_v0 = vmov 0.0   ;;  %vm5845_vm0 = vcmask 1041408   ;;  %s7643_s15 = smov [#allocation2]  }
 0x1fe   :  { %7076 = vmatprep.subr.bf16.mxu1 %v7611_v15  ;;  %20 = vst [vmem:[#allocation2] sm:$0x3] %v7642_v0  ;;  %s5859_s16 = sshll.u32 %s7643_s15, 4  ;;  %s5860_s16 = int_to_ptr.vmem [resolvable:$true] %s5859_s16 }
 0x1ff   :  { %v323_v21 = vcombine.high %v315_v18, %v315_v18  ;;  %v322_v22 = vrot.slane %v308_v19, %v7769_v41  ;;  %v449_v23 = vpack.c.bf16 %v315_v18, %v315_v18  ;;  %s7617_s17 = scalar_lea.vmem %s5860_s16, 32  ;;  %p7622_p1 = scmp.lt.s32.totalorder %s5860_s16, %s5860_s16 }
 0x200   :  { %7055 = vmatpush3.bf16.msra.mxu0 %v7612_v16  ;;  %p7618_p0 = scmp.ne.s32.totalorder %s5860_s16, %s7617_s17  ;;  %p7623_p2 = scmp.lt.s32.totalorder %s7617_s17, %s7617_s17 }
 0x201   :  { %v450_v24 = vpack.c.bf16 %v323_v21, %v323_v21  ;;  %v324_v25 = vcombine.high %v322_v22, %v322_v22  ;;  %7077 = vmatpush3.bf16.msra.mxu1 %v7613_v20  ;;  %v451_v26 = vpack.c.bf16 %v322_v22, %v322_v22 }
 0x202   :  { %p7624_p3 = por %p7623_p2, %p7622_p1 }
 0x203   :  { %5782 = vmatprep.mubr.bf16.mxu0 %v450_v24  ;;  %v452_v27 = vpack.c.bf16 %v324_v25, %v324_v25 }
 0x204   :  { %5783 = vmatmul.mubr.bf16.vlgmr.msra.gmra.mrb[60].mxu0 %v449_v23  ;;  %p7625_p4 = pnand %p7624_p3, %p7618_p0 }
 0x205   :  { %5822 = vmatprep.mubr.bf16.mxu1 %v452_v27 }
 0x206   :  { %5823 = vmatmul.mubr.bf16.vlgmr.msra.gmra.mrb[60].mxu1 %v451_v26 }
 0x216   :  { %v6792_v28 = vpop.f32.mrb[36].mxu0 }
 0x217   :  { %v6814_v29 = vpop.f32.mrb[36].mxu1  ;;  %v6793_v30 = vpop.f32.mrb[37].mxu0 }
 0x218   :  { %v6794_v31 = vadd.f32 %v6793_v30, %v6792_v28  ;;  %v6815_v32 = vpop.f32.mrb[37].mxu1  ;;  %v6795_v33 = vpop.f32.mrb[38].mxu0 }
 0x219   :  { %v6816_v34 = vadd.f32 %v6815_v32, %v6814_v29  ;;  %v6817_v35 = vpop.f32.mrb[38].mxu1  ;;  %v6796_v41 = vpop.f32.mrb[39].mxu0 }
 0x21a   :  { %v5305_v36 = vadd.f32 %v6794_v31, %v5265_v11  ;;  %v6818_v37 = vpop.f32.mrb[39].mxu1 }
 0x21c   :  { %v5345_v38 = vadd.f32 %v6816_v34, %v5305_v36 }
 0x236   :  { %v6836_v39 = vpop.f32.mrb[40].mxu0 }
 0x237   :  { %v6837_v40 = vpop.f32.mrb[41].mxu0  ;;  %v6858_v42 = vpop.f32.mrb[40].mxu1 }
 0x238   :  { %v6838_v43 = vadd.f32 %v6837_v40, %v6836_v39  ;;  %v6839_v44 = vpop.f32.mrb[42].mxu0  ;;  %v6859_v45 = vpop.f32.mrb[41].mxu1 }
 0x239   :  { %v6840_v46 = vpop.f32.mrb[43].mxu0  ;;  %v6860_v48 = vadd.f32 %v6859_v45, %v6858_v42  ;;  %v6861_v49 = vpop.f32.mrb[42].mxu1 }
 0x23a   :  { %v5385_v47 = vadd.f32 %v6838_v43, %v5345_v38  ;;  %v6862_v50 = vpop.f32.mrb[43].mxu1 }
 0x23c   :  { %v5425_v51 = vadd.f32 %v6860_v48, %v5385_v47  ;;  %v453_v47 = vld [vmem:[#allocation2] sm:$0x3] }
 0x256   :  { %v6880_v52 = vpop.f32.mrb[44].mxu0 }
 0x257   :  { %v6881_v53 = vpop.f32.mrb[45].mxu0  ;;  %v6902_v54 = vpop.f32.mrb[44].mxu1 }
 0x258   :  { %v6882_v55 = vadd.f32 %v6881_v53, %v6880_v52  ;;  %v6883_v56 = vpop.f32.mrb[46].mxu0  ;;  %v6903_v57 = vpop.f32.mrb[45].mxu1 }
 0x259   :  { %v6884_v58 = vpop.f32.mrb[47].mxu0  ;;  %v6904_v60 = vadd.f32 %v6903_v57, %v6902_v54  ;;  %v6905_v61 = vpop.f32.mrb[46].mxu1 }
 0x25a   :  { %v5465_v59 = vadd.f32 %v6882_v55, %v5425_v51  ;;  %v6906_v62 = vpop.f32.mrb[47].mxu1  ;;  %v6379_v51 = vld [vmem:[%s9323_s2] ss:$0 sm:$0xff] }
 0x25c   :  { %v5505_v63 = vadd.f32 %v6904_v60, %v5465_v59 }
 0x276   :  { %v6924_v1 = vpop.f32.mrb[48].mxu0 }
 0x277   :  { %v6925_v2 = vpop.f32.mrb[49].mxu0  ;;  %v6946_v3 = vpop.f32.mrb[48].mxu1 }
 0x278   :  { %v6926_v4 = vadd.f32 %v6925_v2, %v6924_v1  ;;  %v6927_v5 = vpop.f32.mrb[50].mxu0  ;;  %v6947_v6 = vpop.f32.mrb[49].mxu1 }
 0x279   :  { %v6928_v7 = vpop.f32.mrb[51].mxu0  ;;  %v6948_v9 = vadd.f32 %v6947_v6, %v6946_v3  ;;  %v6949_v10 = vpop.f32.mrb[50].mxu1 }
 0x27a   :  { %v5545_v8 = vadd.f32 %v6926_v4, %v5505_v63  ;;  %v6950_v11 = vpop.f32.mrb[51].mxu1 }
 0x27c   :  { %v5585_v12 = vadd.f32 %v6948_v9, %v5545_v8 }
 0x296   :  { %v6968_v13 = vpop.f32.mrb[52].mxu0 }
 0x297   :  { %v6969_v14 = vpop.f32.mrb[53].mxu0  ;;  %v6990_v15 = vpop.f32.mrb[52].mxu1 }
 0x298   :  { %v6970_v16 = vadd.f32 %v6969_v14, %v6968_v13  ;;  %v6971_v17 = vpop.f32.mrb[54].mxu0  ;;  %v6991_v18 = vpop.f32.mrb[53].mxu1 }
 0x299   :  { %v6972_v19 = vpop.f32.mrb[55].mxu0  ;;  %v6992_v21 = vadd.f32 %v6991_v18, %v6990_v15  ;;  %v6993_v22 = vpop.f32.mrb[54].mxu1 }
 0x29a   :  { %v5625_v20 = vadd.f32 %v6970_v16, %v5585_v12  ;;  %v6994_v23 = vpop.f32.mrb[55].mxu1 }
 0x29c   :  { %v5665_v24 = vadd.f32 %v6992_v21, %v5625_v20 }
 0x2b6   :  { %v7012_v25 = vpop.f32.mrb[56].mxu0 }
 0x2b7   :  { %v7013_v26 = vpop.f32.mrb[57].mxu0  ;;  %v7034_v27 = vpop.f32.mrb[56].mxu1 }
 0x2b8   :  { %v7014_v28 = vadd.f32 %v7013_v26, %v7012_v25  ;;  %v7015_v29 = vpop.f32.mrb[58].mxu0  ;;  %v7035_v30 = vpop.f32.mrb[57].mxu1 }
 0x2b9   :  { %v7016_v31 = vpop.f32.mrb[59].mxu0  ;;  %v7036_v33 = vadd.f32 %v7035_v30, %v7034_v27  ;;  %v7037_v34 = vpop.f32.mrb[58].mxu1 }
 0x2ba   :  { %v5705_v32 = vadd.f32 %v7014_v28, %v5665_v24  ;;  %v7038_v35 = vpop.f32.mrb[59].mxu1 }
 0x2bc   :  { %v5745_v41 = vadd.f32 %v7036_v33, %v5705_v32 }
 0x2d7   :  { %v7056_v36 = vpop.f32.mrb[60].mxu0 }
 0x2d8   :  { %v7057_v37 = vpop.f32.mrb[61].mxu0 }
 0x2d9   :  { %v7078_v38 = vpop.f32.mrb[60].mxu1  ;;  %v7058_v39 = vadd.f32 %v7057_v37, %v7056_v36  ;;  %v7059_v40 = vpop.f32.mrb[62].mxu0 }
 0x2da   :  { %v7079_v42 = vpop.f32.mrb[61].mxu1  ;;  %v7060_v43 = vpop.f32.mrb[63].mxu0 }
 0x2db   :  { %v5785_v44 = vadd.f32 %v7058_v39, %v5745_v41  ;;  %v7080_v45 = vadd.f32 %v7079_v42, %v7078_v38  ;;  %v7081_v46 = vpop.f32.mrb[62].mxu1 }
 0x2dc   :  { %v7082_v48 = vpop.f32.mrb[63].mxu1 }
 0x2dd   :  { %v5825_v49 = vadd.f32 %v7080_v45, %v5785_v44 }
 0x2df   :  { %v5830_v50 = vadd.f32 %v5825_v49, %v453_v47 }
 0x2e1   :  { %5831 = vst [vmem:[#allocation2] sm:$0x3] %v5830_v50 }
 0x2e8   :  { %v5835_v52 = vld [vmem:[#allocation2] sm:$0x3] }
 0x2e9   :  { %v5843_v53 = vadd.f32 %v6379_v51, %v5835_v52 }
 0x2eb   :  { %v5844_v54 = vmul.f32 %v5843_v53, %v5843_v53 }
 0x2ed   :  { %v5846_v55 = vsel %vm5845_vm0, %v5844_v54, 0.0 }
 0x2ee   :  { %5847 = vadd.xlane.f32.xlu0 %v5846_v55 }
 0x37b   :  { %v5848_v56 = vpop.xlane.xlu0 %5847 }
 0x37c   :  { %v5849_v57 = vmax.f32 %v5848_v56, 1e-24 }
 0x37e   :  { %7615 = vrsqrt.f32 %v5849_v57 }
 0x388   :  { %v7616_v58 = vpop.eup %7615 }
 0x389   :  { %v5851_v59 = vmul.f32 %v7616_v58, %v5843_v53 }
 0x38b   :  { %5852 = vst [vmem:[#allocation2] sm:$0x3] %v5851_v59 }
 0x38c   :  { %7628 = shalt.err (!%p7625_p4)
}
 0x38d   :  { %s7629_s19 = scalar_lea.hbm %s9324_s3, 32 }
 0x38e   :  { %p7630_p5 = scmp.ne.s32.totalorder %s9324_s3, %s7629_s19  ;;  %p7633_p6 = scmp.lt.u32.totalorder %s7629_s19, %s9324_s3 }
 0x390   :  { %p7635_p7 = pnand %p7633_p6, %p7630_p5 }
 0x392   :  { %7638 = shalt.err (!%p7635_p7)
}
 0x393   :  { %5862 = dma.vmem_to_hbm [thread:$0]  %s5860_s16, 32, %s9324_s3, [#allocation3]  }
 0x394   :  { %7639 = dma.done.wait [#allocation3], 32  }
 0x395   :  { %7640 = vsyncadd [#allocation3], 4294967264 }
 0x396   :  { %5866 = vsyncpa [#allocation3], 1 }

</bundles_post_ra>
